<compile_context>
chip_gen: v7x
topology: tpu7x:2x2x1
jax: 0.10.0
libtpu: 0.0.40
codegen_flags: <defaults>
</compile_context>

<pallas_src>
import jax
import jax.numpy as jnp
from jax.experimental import pallas as pl
from jax.experimental.pallas import tpu as pltpu

HIDDEN = 768
OUT = 256


def _round_up(x, m):
    return (x + m - 1) // m * m


def tuner_mlp_kernel(x_ref, w1_ref, b1_ref, w2_ref, b2_ref, o_ref):
    # Linear -> ReLU -> Linear on one (tm, E) row tile, f32 accumulation.
    x = x_ref[...].astype(jnp.bfloat16)                          # (tm, E)
    h = jnp.dot(x, w1_ref[...], preferred_element_type=jnp.float32)
    h = jnp.maximum(h + b1_ref[...], 0.0)                        # (tm, H) f32
    out = jnp.dot(h.astype(jnp.bfloat16), w2_ref[...],
                  preferred_element_type=jnp.float32)
    o_ref[...] = out + b2_ref[...]                               # (tm, O) f32


def _build_call(Mp, tm, E, use_buffered):
    H, O = HIDDEN, OUT

    def const_spec(shape):
        # Weights/biases never change block index; keep a single VMEM buffer
        # instead of the default double buffer when supported.
        if use_buffered:
            return pl.BlockSpec(shape, lambda i: (0, 0),
                                pipeline_mode=pl.Buffered(1))
        return pl.BlockSpec(shape, lambda i: (0, 0))

    flops = 2 * Mp * (E * H + H * O)
    bytes_accessed = (Mp * E * 4            # x (f32 in HBM)
                      + E * H * 2 + H * 4   # w1 (bf16) + b1 (f32)
                      + H * O * 2 + O * 4   # w2 (bf16) + b2 (f32)
                      + Mp * O * 4)         # output (f32)

    return pl.pallas_call(
        tuner_mlp_kernel,
        out_shape=jax.ShapeDtypeStruct((Mp, O), jnp.float32),
        grid=(Mp // tm,),
        in_specs=[
            pl.BlockSpec((tm, E), lambda i: (i, 0)),   # activations stream
            const_spec((E, H)),                        # w1 (bf16, resident)
            const_spec((1, H)),                        # b1 (f32)
            const_spec((H, O)),                        # w2 (bf16, resident)
            const_spec((1, O)),                        # b2 (f32)
        ],
        out_specs=pl.BlockSpec((tm, O), lambda i: (i, 0)),
        compiler_params=pltpu.CompilerParams(
            dimension_semantics=("parallel",)),        # 2 TCs on v7x
        cost_estimate=pl.CostEstimate(
            flops=flops, transcendentals=0, bytes_accessed=bytes_accessed),
    )


def tuner_mlp(x2d, w1_bf16, b1, w2_bf16, b2):
    """x2d: (M, E) float32 -> (M, 256) float32."""
    M, E = x2d.shape
    # Row tile: 256 rows in steady state; small M rounded up to a sublane pack.
    tm = min(256, _round_up(M, 16))
    Mp = _round_up(M, tm)
    if Mp != M:
        x2d = jnp.pad(x2d, ((0, Mp - M), (0, 0)))
    try:
        out = _build_call(Mp, tm, E, use_buffered=True)(
            x2d, w1_bf16, b1, w2_bf16, b2)
    except Exception:
        # Fallback for JAX builds without single-buffer pipeline_mode support.
        out = _build_call(Mp, tm, E, use_buffered=False)(
            x2d, w1_bf16, b1, w2_bf16, b2)
    return out[:M]


def tuner_forward(X, params):
    """X: (B, 3, E) -> (anchor, pos, neg), each (B, 256) float32."""
    B, T, E = X.shape
    assert T == 3
    w1, b1, w2, b2 = params
    # Row-major flatten: row b*3 + t holds X[b, t, :]; no transpose, no copy.
    x2d = X.reshape(B * 3, E).astype(jnp.float32)
    out = tuner_mlp(x2d, w1, b1, w2, b2).reshape(B, 3, OUT)
    return out[:, 0, :], out[:, 1, :], out[:, 2, :]


def init_params(key, embedding_size, hidden=HIDDEN, out=OUT):
    """f32 params mimicking nn.Linear's uniform(-1/sqrt(fan_in), +) init.

    Weights stored as (in_features, out_features): transpose of PyTorch's
    (out, in), same math (kernel computes x @ W + b)."""
    k1, k2, k3, k4 = jax.random.split(key, 4)
    lim1 = 1.0 / jnp.sqrt(embedding_size)
    lim2 = 1.0 / jnp.sqrt(hidden)
    w1 = jax.random.uniform(k1, (embedding_size, hidden), jnp.float32, -lim1, lim1)
    b1 = jax.random.uniform(k2, (1, hidden), jnp.float32, -lim1, lim1)
    w2 = jax.random.uniform(k3, (hidden, out), jnp.float32, -lim2, lim2)
    b2 = jax.random.uniform(k4, (1, out), jnp.float32, -lim2, lim2)
    return w1, b1, w2, b2


def prepare_params(params):
    """One-time cast of weight matrices to bf16 (biases stay f32)."""
    w1, b1, w2, b2 = params
    return w1.astype(jnp.bfloat16), b1, w2.astype(jnp.bfloat16), b2


if __name__ == "__main__":
    key = jax.random.PRNGKey(0)
    kx, kp = jax.random.split(key)

    # Small shapes consistent with the module (default E is 4096; kept small).
    B, E = 2, 512
    X = jax.random.normal(kx, (B, 3, E), dtype=jnp.float32)
    params_f32 = init_params(kp, E)
    params = prepare_params(params_f32)   # cast once, outside the hot path

    anchor, pos, neg = tuner_forward(X, params)
    jax.block_until_ready((anchor, pos, neg))

    # Reference in plain JAX with the same bf16-weight / f32-accumulate math.
    w1b, b1, w2b, b2 = params

    def ref_pass(x):
        h = jnp.dot(x.astype(jnp.bfloat16), w1b,
                    preferred_element_type=jnp.float32) + b1
        h = jnp.maximum(h, 0.0)
        return jnp.dot(h.astype(jnp.bfloat16), w2b,
                       preferred_element_type=jnp.float32) + b2

    ref_a = ref_pass(X[:, 0, :])
    ref_p = ref_pass(X[:, 1, :])
    ref_n = ref_pass(X[:, 2, :])

    assert anchor.shape == (B, OUT) and pos.shape == (B, OUT) and neg.shape == (B, OUT)
    assert jnp.allclose(anchor, ref_a, atol=1e-2, rtol=1e-2)
    assert jnp.allclose(pos, ref_p, atol=1e-2, rtol=1e-2)
    assert jnp.allclose(neg, ref_n, atol=1e-2, rtol=1e-2)

    print("KERNEL_OK")
</pallas_src>

<mosaic_0001>
module attributes {stable_mosaic.version = 11 : i64} {
  func.func @tuner_mlp_kernel(%arg0: i32, %arg1: memref<16x512xf32, #tpu.memory_space<vmem>>, %arg2: memref<512x768xbf16, #tpu.memory_space<vmem>>, %arg3: memref<1x768xf32, #tpu.memory_space<vmem>>, %arg4: memref<768x256xbf16, #tpu.memory_space<vmem>>, %arg5: memref<1x256xf32, #tpu.memory_space<vmem>>, %arg6: memref<16x256xf32, #tpu.memory_space<vmem>>) attributes {dimension_semantics = [#tpu.dimension_semantics<parallel>], iteration_bounds = array<i64: 1>, scalar_prefetch = 0 : i64, scratch_operands = 0 : i64, tpu.core_type = #tpu.core_type<tc>, window_params = [{transform_indices = @transform_0, window_bounds = array<i64: 16, 512>}, {pipeline_mode = #tpu.pipeline_mode<synchronous>, transform_indices = @transform_1, window_bounds = array<i64: 512, 768>}, {pipeline_mode = #tpu.pipeline_mode<synchronous>, transform_indices = @transform_2, window_bounds = array<i64: 1, 768>}, {pipeline_mode = #tpu.pipeline_mode<synchronous>, transform_indices = @transform_3, window_bounds = array<i64: 768, 256>}, {pipeline_mode = #tpu.pipeline_mode<synchronous>, transform_indices = @transform_4, window_bounds = array<i64: 1, 256>}, {transform_indices = @transform_5, window_bounds = array<i64: 16, 256>}]} {
    %c0 = arith.constant 0 : index
    %c0_0 = arith.constant 0 : index
    %0 = vector.load %arg1[%c0, %c0_0] : memref<16x512xf32, #tpu.memory_space<vmem>>, vector<16x512xf32>
    %1 = arith.truncf %0 : vector<16x512xf32> to vector<16x512xbf16>
    %c0_1 = arith.constant 0 : index
    %c0_2 = arith.constant 0 : index
    %2 = vector.load %arg2[%c0_1, %c0_2] : memref<512x768xbf16, #tpu.memory_space<vmem>>, vector<512x768xbf16>
    %cst = arith.constant dense<0.000000e+00> : vector<16x768xf32>
    %3 = tpu.matmul %1, %2, %cst {dimension_numbers = #tpu.dot_dimension_numbers<[1], [0], [0], [1], [0, 0, 1, 1], [], []>} : vector<16x512xbf16>, vector<512x768xbf16>, vector<16x768xf32> -> vector<16x768xf32>
    %c0_3 = arith.constant 0 : index
    %c0_4 = arith.constant 0 : index
    %4 = vector.load %arg3[%c0_3, %c0_4] : memref<1x768xf32, #tpu.memory_space<vmem>>, vector<1x768xf32>
    %5 = vector.broadcast %4 : vector<1x768xf32> to vector<16x768xf32>
    %6 = arith.addf %3, %5 : vector<16x768xf32>
    %cst_5 = arith.constant 0.000000e+00 : f32
    %7 = vector.broadcast %cst_5 : f32 to vector<16x768xf32>
    %8 = arith.maximumf %6, %7 : vector<16x768xf32>
    %9 = arith.truncf %8 : vector<16x768xf32> to vector<16x768xbf16>
    %c0_6 = arith.constant 0 : index
    %c0_7 = arith.constant 0 : index
    %10 = vector.load %arg4[%c0_6, %c0_7] : memref<768x256xbf16, #tpu.memory_space<vmem>>, vector<768x256xbf16>
    %cst_8 = arith.constant dense<0.000000e+00> : vector<16x256xf32>
    %11 = tpu.matmul %9, %10, %cst_8 {dimension_numbers = #tpu.dot_dimension_numbers<[1], [0], [0], [1], [0, 0, 1, 1], [], []>} : vector<16x768xbf16>, vector<768x256xbf16>, vector<16x256xf32> -> vector<16x256xf32>
    %c0_9 = arith.constant 0 : index
    %c0_10 = arith.constant 0 : index
    %12 = vector.load %arg5[%c0_9, %c0_10] : memref<1x256xf32, #tpu.memory_space<vmem>>, vector<1x256xf32>
    %13 = vector.broadcast %12 : vector<1x256xf32> to vector<16x256xf32>
    %14 = arith.addf %11, %13 : vector<16x256xf32>
    %c0_11 = arith.constant 0 : index
    %c0_12 = arith.constant 0 : index
    %15 = vector.load %arg6[%c0_11, %c0_12] : memref<16x256xf32, #tpu.memory_space<vmem>>, vector<16x256xf32>
    tpu.vector_store %arg6[%c0_11, %c0_12], %14 {strides = array<i32>} : memref<16x256xf32, #tpu.memory_space<vmem>>, vector<16x256xf32>,
    return
  }
  func.func @transform_0(%arg0: i32) -> (i32, i32) {
    %c0_i32 = arith.constant 0 : i32
    %c0_i32_0 = arith.constant 0 : i32
    return %arg0, %c0_i32 : i32, i32
  }
  func.func @transform_1(%arg0: i32) -> (i32, i32) {
    %c0_i32 = arith.constant 0 : i32
    %c0_i32_0 = arith.constant 0 : i32
    %c0_i32_1 = arith.constant 0 : i32
    return %c0_i32, %c0_i32_0 : i32, i32
  }
  func.func @transform_2(%arg0: i32) -> (i32, i32) {
    %c0_i32 = arith.constant 0 : i32
    %c0_i32_0 = arith.constant 0 : i32
    %c0_i32_1 = arith.constant 0 : i32
    return %c0_i32, %c0_i32_0 : i32, i32
  }
  func.func @transform_3(%arg0: i32) -> (i32, i32) {
    %c0_i32 = arith.constant 0 : i32
    %c0_i32_0 = arith.constant 0 : i32
    %c0_i32_1 = arith.constant 0 : i32
    return %c0_i32, %c0_i32_0 : i32, i32
  }
  func.func @transform_4(%arg0: i32) -> (i32, i32) {
    %c0_i32 = arith.constant 0 : i32
    %c0_i32_0 = arith.constant 0 : i32
    %c0_i32_1 = arith.constant 0 : i32
    return %c0_i32, %c0_i32_0 : i32, i32
  }
  func.func @transform_5(%arg0: i32) -> (i32, i32) {
    %c0_i32 = arith.constant 0 : i32
    %c0_i32_0 = arith.constant 0 : i32
    return %arg0, %c0_i32 : i32, i32
  }
}

module attributes {stable_mosaic.version = 11 : i64} {
  func.func @tuner_mlp_kernel(%arg0: i32, %arg1: memref<16x512xf32, #tpu.memory_space<vmem>>, %arg2: memref<512x768xbf16, #tpu.memory_space<vmem>>, %arg3: memref<1x768xf32, #tpu.memory_space<vmem>>, %arg4: memref<768x256xbf16, #tpu.memory_space<vmem>>, %arg5: memref<1x256xf32, #tpu.memory_space<vmem>>, %arg6: memref<16x256xf32, #tpu.memory_space<vmem>>) attributes {dimension_semantics = [#tpu.dimension_semantics<parallel>], iteration_bounds = array<i64: 1>, scalar_prefetch = 0 : i64, scratch_operands = 0 : i64, tpu.core_type = #tpu.core_type<tc>, window_params = [{transform_indices = @transform_0, window_bounds = array<i64: 16, 512>}, {pipeline_mode = #tpu.pipeline_mode<synchronous>, transform_indices = @transform_1, window_bounds = array<i64: 512, 768>}, {pipeline_mode = #tpu.pipeline_mode<synchronous>, transform_indices = @transform_2, window_bounds = array<i64: 1, 768>}, {pipeline_mode = #tpu.pipeline_mode<synchronous>, transform_indices = @transform_3, window_bounds = array<i64: 768, 256>}, {pipeline_mode = #tpu.pipeline_mode<synchronous>, transform_indices = @transform_4, window_bounds = array<i64: 1, 256>}, {transform_indices = @transform_5, window_bounds = array<i64: 16, 256>}]} {
    %c0 = arith.constant 0 : index
    %c0_0 = arith.constant 0 : index
    %0 = vector.load %arg1[%c0, %c0_0] : memref<16x512xf32, #tpu.memory_space<vmem>>, vector<16x512xf32>
    %1 = arith.truncf %0 : vector<16x512xf32> to vector<16x512xbf16>
    %c0_1 = arith.constant 0 : index
    %c0_2 = arith.constant 0 : index
    %2 = vector.load %arg2[%c0_1, %c0_2] : memref<512x768xbf16, #tpu.memory_space<vmem>>, vector<512x768xbf16>
    %cst = arith.constant dense<0.000000e+00> : vector<16x768xf32>
    %3 = tpu.matmul %1, %2, %cst {dimension_numbers = #tpu.dot_dimension_numbers<[1], [0], [0], [1], [0, 0, 1, 1], [], []>} : vector<16x512xbf16>, vector<512x768xbf16>, vector<16x768xf32> -> vector<16x768xf32>
    %c0_3 = arith.constant 0 : index
    %c0_4 = arith.constant 0 : index
    %4 = vector.load %arg3[%c0_3, %c0_4] : memref<1x768xf32, #tpu.memory_space<vmem>>, vector<1x768xf32>
    %5 = vector.broadcast %4 : vector<1x768xf32> to vector<16x768xf32>
    %6 = arith.addf %3, %5 : vector<16x768xf32>
    %cst_5 = arith.constant 0.000000e+00 : f32
    %7 = vector.broadcast %cst_5 : f32 to vector<16x768xf32>
    %8 = arith.maximumf %6, %7 : vector<16x768xf32>
    %9 = arith.truncf %8 : vector<16x768xf32> to vector<16x768xbf16>
    %c0_6 = arith.constant 0 : index
    %c0_7 = arith.constant 0 : index
    %10 = vector.load %arg4[%c0_6, %c0_7] : memref<768x256xbf16, #tpu.memory_space<vmem>>, vector<768x256xbf16>
    %cst_8 = arith.constant dense<0.000000e+00> : vector<16x256xf32>
    %11 = tpu.matmul %9, %10, %cst_8 {dimension_numbers = #tpu.dot_dimension_numbers<[1], [0], [0], [1], [0, 0, 1, 1], [], []>} : vector<16x768xbf16>, vector<768x256xbf16>, vector<16x256xf32> -> vector<16x256xf32>
    %c0_9 = arith.constant 0 : index
    %c0_10 = arith.constant 0 : index
    %12 = vector.load %arg5[%c0_9, %c0_10] : memref<1x256xf32, #tpu.memory_space<vmem>>, vector<1x256xf32>
    %13 = vector.broadcast %12 : vector<1x256xf32> to vector<16x256xf32>
    %14 = arith.addf %11, %13 : vector<16x256xf32>
    %c0_11 = arith.constant 0 : index
    %c0_12 = arith.constant 0 : index
    %15 = vector.load %arg6[%c0_11, %c0_12] : memref<16x256xf32, #tpu.memory_space<vmem>>, vector<16x256xf32>
    tpu.vector_store %arg6[%c0_11, %c0_12], %14 {strides = array<i32>} : memref<16x256xf32, #tpu.memory_space<vmem>>, vector<16x256xf32>,
    return
  }
  func.func @transform_0(%arg0: i32) -> (i32, i32) {
    %c0_i32 = arith.constant 0 : i32
    %c0_i32_0 = arith.constant 0 : i32
    return %arg0, %c0_i32 : i32, i32
  }
  func.func @transform_1(%arg0: i32) -> (i32, i32) {
    %c0_i32 = arith.constant 0 : i32
    %c0_i32_0 = arith.constant 0 : i32
    %c0_i32_1 = arith.constant 0 : i32
    return %c0_i32, %c0_i32_0 : i32, i32
  }
  func.func @transform_2(%arg0: i32) -> (i32, i32) {
    %c0_i32 = arith.constant 0 : i32
    %c0_i32_0 = arith.constant 0 : i32
    %c0_i32_1 = arith.constant 0 : i32
    return %c0_i32, %c0_i32_0 : i32, i32
  }
  func.func @transform_3(%arg0: i32) -> (i32, i32) {
    %c0_i32 = arith.constant 0 : i32
    %c0_i32_0 = arith.constant 0 : i32
    %c0_i32_1 = arith.constant 0 : i32
    return %c0_i32, %c0_i32_0 : i32, i32
  }
  func.func @transform_4(%arg0: i32) -> (i32, i32) {
    %c0_i32 = arith.constant 0 : i32
    %c0_i32_0 = arith.constant 0 : i32
    %c0_i32_1 = arith.constant 0 : i32
    return %c0_i32, %c0_i32_0 : i32, i32
  }
  func.func @transform_5(%arg0: i32) -> (i32, i32) {
    %c0_i32 = arith.constant 0 : i32
    %c0_i32_0 = arith.constant 0 : i32
    return %arg0, %c0_i32 : i32, i32
  }
}

</mosaic_0001>

<bundles_post_ra>
// kernel: tpu_custom_call.1
= control target key start
LH: loop header
LB: loop body
LE: loop exit
PB: predicated region body
PF: predicated region fallthrough
CT: control target
= control target key end

     0   :  { %10 = vsyncpa [#allocation3], 0  ;;  %s3278_s0 = inlined_call_operand.hbm [shape: f32[16,512], index: 0, kind: input, shape index: {}]   ;;  %s3279_s1 = inlined_call_operand.hbm [shape: bf16[512,768], index: 1, kind: input, shape index: {}]   ;;  %s3280_s2 = inlined_call_operand.vmem [shape: f32[1,768], index: 2, kind: input, shape index: {}]   ;;  %s3281_s3 = inlined_call_operand.hbm [shape: bf16[768,256], index: 3, kind: input, shape index: {}]   ;;  %s3282_s4 = inlined_call_operand.vmem [shape: f32[1,256], index: 4, kind: input, shape index: {}]   ;;  %s3283_s5 = inlined_call_operand.hbm [shape: f32[16,256], index: 5, kind: output, shape index: {}]  }
   0x1   :  { %11 = vsyncpa [#allocation6], 0 }
   0x2   :  { %12 = vsyncpa [#allocation4], 0  ;;  %s3135_s18 = smov [#allocation5]   ;;  %s3041_s22 = scalar_lea.hbm %s3279_s1, 24576 }
   0x3   :  { %s30_s19 = sshll.u32 %s3135_s18, 4  ;;  %p3042_p0 = scmp.ne.s32.totalorder %s3279_s1, %s3041_s22  ;;  %s31_s19 = int_to_ptr.vmem [resolvable:$true] %s30_s19 }
   0x4   :  { %p3045_p1 = scmp.lt.u32.totalorder %s3041_s22, %s3279_s1 }
   0x6   :  { %p3047_p2 = pnand %p3045_p1, %p3042_p0 }
   0x8   :  { %3050 = shalt.err (!%p3047_p2)
}
   0x9   :  { %s3051_s27 = scalar_lea.vmem %s31_s19, 24576  ;;  %p3056_p4 = scmp.lt.s32.totalorder %s31_s19, %s31_s19 }
   0xa   :  { %p3052_p3 = scmp.ne.s32.totalorder %s31_s19, %s3051_s27  ;;  %p3057_p5 = scmp.lt.s32.totalorder %s3051_s27, %s3051_s27 }
   0xc   :  { %p3058_p6 = por %p3057_p5, %p3056_p4 }
   0xe   :  { %p3059_p7 = pnand %p3058_p6, %p3052_p3 }
  0x10   :  { %3062 = shalt.err (!%p3059_p7)
}
  0x11   :  { %s3136_s28 = smov 384   ;;  %s3137_s29 = smov 24  }
  0x12   :  { %36 = dma.hbm_to_vmem [thread:$0]  %s3279_s1, 24576, %s31_s19, [#allocation6], %s3136_s28, %s3136_s28, %s3137_s29  }
  0x13   :  { %s3138_s7 = smov [#allocation2]   ;;  %s3063_s11 = scalar_lea.hbm %s3278_s0, 1024 }
  0x14   :  { %s18_s8 = sshll.u32 %s3138_s7, 4  ;;  %p3064_p8 = scmp.ne.s32.totalorder %s3278_s0, %s3063_s11  ;;  %s19_s8 = int_to_ptr.vmem [resolvable:$true] %s18_s8 }
  0x15   :  { %p3067_p9 = scmp.lt.u32.totalorder %s3063_s11, %s3278_s0 }
  0x17   :  { %p3069_p10 = pnand %p3067_p9, %p3064_p8 }
  0x19   :  { %3072 = shalt.err (!%p3069_p10)
}
  0x1a   :  { %s3073_s16 = scalar_lea.vmem %s19_s8, 1024  ;;  %p3078_p12 = scmp.lt.s32.totalorder %s19_s8, %s19_s8 }
  0x1b   :  { %p3074_p11 = scmp.ne.s32.totalorder %s19_s8, %s3073_s16  ;;  %p3079_p13 = scmp.lt.s32.totalorder %s3073_s16, %s3073_s16 }
  0x1d   :  { %p3080_p0 = por %p3079_p13, %p3078_p12 }
  0x1f   :  { %p3081_p1 = pnand %p3080_p0, %p3074_p11 }
  0x21   :  { %3084 = shalt.err (!%p3081_p1)
}
  0x22   :  { %s3139_s1 = smov 512   ;;  %s3140_s17 = smov 32  }
  0x23   :  { %24 = dma.hbm_to_vmem [thread:$0]  %s3278_s0, 1024, %s19_s8, [#allocation3], %s3139_s1, %s3139_s1, %s3140_s17  }
  0x24   :  { %s3141_s20 = smov [#allocation7]   ;;  %s3085_s24 = scalar_lea.hbm %s3281_s3, 12288 }
  0x25   :  { %s44_s21 = sshll.u32 %s3141_s20, 4  ;;  %p3086_p2 = scmp.ne.s32.totalorder %s3281_s3, %s3085_s24  ;;  %s45_s21 = int_to_ptr.vmem [resolvable:$true] %s44_s21 }
  0x26   :  { %p3089_p3 = scmp.lt.u32.totalorder %s3085_s24, %s3281_s3 }
  0x28   :  { %p3091_p4 = pnand %p3089_p3, %p3086_p2 }
  0x2a   :  { %3094 = shalt.err (!%p3091_p4)
}
  0x2b   :  { %s3095_s29 = scalar_lea.vmem %s45_s21, 12288  ;;  %p3100_p6 = scmp.lt.s32.totalorder %s45_s21, %s45_s21 }
  0x2c   :  { %p3096_p5 = scmp.ne.s32.totalorder %s45_s21, %s3095_s29  ;;  %p3101_p7 = scmp.lt.s32.totalorder %s3095_s29, %s3095_s29 }
  0x2e   :  { %p3102_p8 = por %p3101_p7, %p3100_p6 }
  0x30   :  { %p3103_p9 = pnand %p3102_p8, %p3096_p5 }
  0x32   :  { %3106 = shalt.err (!%p3103_p9)
}
  0x33   :  { %s3142_s0 = smov 128   ;;  %s3143_s30 = smov 8  }
  0x34   :  { %50 = dma.hbm_to_vmem [thread:$0]  %s3281_s3, 12288, %s45_s21, [#allocation6], %s3142_s0, %s3142_s0, %s3143_s30  }
  0x35   :  { %3129 = dma.done.wait [#allocation3], 1024  }
  0x36   :  { %3130 = vsyncadd [#allocation3], 4294966272 }
  0x37   :  { %3131 = dma.done.wait [#allocation6], 36864  }
  0x38   :  { %3132 = vsyncadd [#allocation6], 4294930432  ;;  %v2609_v0 = vld [vmem:[#allocation5 + $0x4] ss:$24 sps:$4 sm:$0xff]   ;;  %v2613_v2 = vld [vmem:[#allocation5] ss:$24 sps:$4 sm:$0xff]  }
  0x39   :  { %v2611_v1 = vld [vmem:[#allocation5 + $0xc] ss:$24 sps:$4 sm:$0xff]   ;;  %1258 = vmatprep.subr.bf16.mxu0 %v2609_v0  ;;  %v2614_v3 = vld [vmem:[#allocation5 + $0x8] ss:$24 sps:$4 sm:$0xff]   ;;  %v2617_v5 = vld [vmem:[#allocation5 + $0x3c] ss:$24 sps:$4 sm:$0xff]  }
  0x3a   :  { %1344 = vmatprep.subr.bf16.mxu1 %v2611_v1  ;;  %v2615_v4 = vld [vmem:[#allocation5 + $0x34] ss:$24 sps:$4 sm:$0xff]   ;;  %1259 = vmatpush1.bf16.msra.mxu0 %v2613_v2  ;;  %v2619_v6 = vld [vmem:[#allocation5 + $0x30] ss:$24 sps:$4 sm:$0xff]   ;;  %v2621_v8 = vld [vmem:[#allocation5 + $0x64] ss:$24 sps:$4 sm:$0xff]  }
  0x3b   :  { %1345 = vmatpush1.bf16.msra.mxu1 %v2614_v3  ;;  %1260 = vmatprep.subr.bf16.mxu0 %v2615_v4  ;;  %v2620_v7 = vld [vmem:[#allocation5 + $0x38] ss:$24 sps:$4 sm:$0xff]   ;;  %v2623_v9 = vld [vmem:[#allocation5 + $0x6c] ss:$24 sps:$4 sm:$0xff]   ;;  %v2626_v11 = vld [vmem:[#allocation5 + $0x68] ss:$24 sps:$4 sm:$0xff]  }
  0x3c   :  { %1346 = vmatprep.subr.bf16.mxu1 %v2617_v5  ;;  %v2625_v10 = vld [vmem:[#allocation5 + $0x60] ss:$24 sps:$4 sm:$0xff]   ;;  %v2627_v12 = vld [vmem:[#allocation5 + $0x94] ss:$24 sps:$4 sm:$0xff]   ;;  %v2631_v14 = vld [vmem:[#allocation5 + $0x90] ss:$24 sps:$4 sm:$0xff]  }
  0x3d   :  { %v2629_v13 = vld [vmem:[#allocation5 + $0x9c] ss:$24 sps:$4 sm:$0xff]   ;;  %v2632_v15 = vld [vmem:[#allocation5 + $0x98] ss:$24 sps:$4 sm:$0xff]   ;;  %v2635_v17 = vld [vmem:[#allocation5 + $0xcc] ss:$24 sps:$4 sm:$0xff]  }
  0x3e   :  { %1261 = vmatpush1.bf16.msra.mxu0 %v2619_v6  ;;  %v2633_v16 = vld [vmem:[#allocation5 + $0xc4] ss:$24 sps:$4 sm:$0xff]   ;;  %v2637_v18 = vld [vmem:[#allocation5 + $0xc0] ss:$24 sps:$4 sm:$0xff]   ;;  %v2639_v20 = vld [vmem:[#allocation5 + $0xf4] ss:$24 sps:$4 sm:$0xff]  }
  0x3f   :  { %1347 = vmatpush1.bf16.msra.mxu1 %v2620_v7  ;;  %1262 = vmatprep.subr.bf16.mxu0 %v2621_v8  ;;  %v2638_v19 = vld [vmem:[#allocation5 + $0xc8] ss:$24 sps:$4 sm:$0xff]   ;;  %v2641_v21 = vld [vmem:[#allocation5 + $0xfc] ss:$24 sps:$4 sm:$0xff]   ;;  %v2644_v23 = vld [vmem:[#allocation5 + $0xf8] ss:$24 sps:$4 sm:$0xff]  }
  0x40   :  { %1348 = vmatprep.subr.bf16.mxu1 %v2623_v9  ;;  %v2643_v22 = vld [vmem:[#allocation5 + $0xf0] ss:$24 sps:$4 sm:$0xff]   ;;  %v2645_v24 = vld [vmem:[#allocation5 + $0x124] ss:$24 sps:$4 sm:$0xff]   ;;  %v2649_v26 = vld [vmem:[#allocation5 + $0x120] ss:$24 sps:$4 sm:$0xff]  }
  0x41   :  { %v2647_v25 = vld [vmem:[#allocation5 + $0x12c] ss:$24 sps:$4 sm:$0xff]   ;;  %v2650_v27 = vld [vmem:[#allocation5 + $0x128] ss:$24 sps:$4 sm:$0xff]   ;;  %v2653_v29 = vld [vmem:[#allocation5 + $0x15c] ss:$24 sps:$4 sm:$0xff]  }
  0x42   :  { %1263 = vmatpush1.bf16.msra.mxu0 %v2625_v10  ;;  %v2651_v28 = vld [vmem:[#allocation5 + $0x154] ss:$24 sps:$4 sm:$0xff]   ;;  %v2655_v30 = vld [vmem:[#allocation5 + $0x150] ss:$24 sps:$4 sm:$0xff]   ;;  %v2657_v32 = vld [vmem:[#allocation5 + $0x184] ss:$24 sps:$4 sm:$0xff]  }
  0x43   :  { %1349 = vmatpush1.bf16.msra.mxu1 %v2626_v11  ;;  %1264 = vmatprep.subr.bf16.mxu0 %v2627_v12  ;;  %v2656_v31 = vld [vmem:[#allocation5 + $0x158] ss:$24 sps:$4 sm:$0xff]   ;;  %v2659_v33 = vld [vmem:[#allocation5 + $0x18c] ss:$24 sps:$4 sm:$0xff]   ;;  %v2662_v35 = vld [vmem:[#allocation5 + $0x188] ss:$24 sps:$4 sm:$0xff]  }
  0x44   :  { %1350 = vmatprep.subr.bf16.mxu1 %v2629_v13  ;;  %v2661_v34 = vld [vmem:[#allocation5 + $0x180] ss:$24 sps:$4 sm:$0xff]   ;;  %v2663_v36 = vld [vmem:[#allocation5 + $0x1b4] ss:$24 sps:$4 sm:$0xff]   ;;  %v2667_v38 = vld [vmem:[#allocation5 + $0x1b0] ss:$24 sps:$4 sm:$0xff]  }
  0x45   :  { %v2665_v37 = vld [vmem:[#allocation5 + $0x1bc] ss:$24 sps:$4 sm:$0xff]   ;;  %v2668_v39 = vld [vmem:[#allocation5 + $0x1b8] ss:$24 sps:$4 sm:$0xff]   ;;  %v2671_v41 = vld [vmem:[#allocation5 + $0x1ec] ss:$24 sps:$4 sm:$0xff]  }
  0x46   :  { %1265 = vmatpush1.bf16.msra.mxu0 %v2631_v14  ;;  %v2669_v40 = vld [vmem:[#allocation5 + $0x1e4] ss:$24 sps:$4 sm:$0xff]   ;;  %v2673_v42 = vld [vmem:[#allocation5 + $0x1e0] ss:$24 sps:$4 sm:$0xff]   ;;  %v2675_v44 = vld [vmem:[#allocation5 + $0x214] ss:$24 sps:$4 sm:$0xff]  }
  0x47   :  { %1351 = vmatpush1.bf16.msra.mxu1 %v2632_v15  ;;  %1266 = vmatprep.subr.bf16.mxu0 %v2633_v16  ;;  %v2674_v43 = vld [vmem:[#allocation5 + $0x1e8] ss:$24 sps:$4 sm:$0xff]   ;;  %v2677_v45 = vld [vmem:[#allocation5 + $0x21c] ss:$24 sps:$4 sm:$0xff]   ;;  %v2680_v49 = vld [vmem:[#allocation5 + $0x218] ss:$24 sps:$4 sm:$0xff]  }
  0x48   :  { %1352 = vmatprep.subr.bf16.mxu1 %v2635_v17  ;;  %v63_v46 = vld [vmem:[#allocation2 + $0x8] sm:$0xff]  ;;  %v2681_v51 = vld [vmem:[#allocation5 + $0x244] ss:$24 sps:$4 sm:$0xff]   ;;  %v2685_v53 = vld [vmem:[#allocation5 + $0x240] ss:$24 sps:$4 sm:$0xff]   ;;  %s3144_s10 = smov [#allocation8]  }
  0x49   :  { %v67_v47 = vld [vmem:[#allocation2 + $0x28] sm:$0xff]  ;;  %v2689_v56 = vld [vmem:[#allocation5 + $0x27c] ss:$24 sps:$4 sm:$0xff]   ;;  %v2692_v58 = vld [vmem:[#allocation5 + $0x278] ss:$24 sps:$4 sm:$0xff]   ;;  %s2260_s11 = sshll.u32 %s3144_s10, 4  ;;  %s2261_s11 = int_to_ptr.vmem [resolvable:$true] %s2260_s11 }
  0x4a   :  { %1267 = vmatpush1.bf16.msra.mxu0 %v2637_v18  ;;  %v2679_v48 = vld [vmem:[#allocation5 + $0x210] ss:$24 sps:$4 sm:$0xff]   ;;  %v3213_v50 = vpack.c.bf16 %v67_v47, %v63_v46  ;;  %v2683_v52 = vld [vmem:[#allocation5 + $0x24c] ss:$24 sps:$4 sm:$0xff]   ;;  %v2697_v61 = vld [vmem:[#allocation5 + $0x2a0] ss:$24 sps:$4 sm:$0xff]   ;;  %p3112_p11 = scmp.lt.s32.totalorder %s2261_s11, %s2261_s11 }
  0x4b   :  { %1353 = vmatpush1.bf16.msra.mxu1 %v2638_v19  ;;  %1268 = vmatprep.subr.bf16.mxu0 %v2639_v20  ;;  %v2686_v54 = vld [vmem:[#allocation5 + $0x248] ss:$24 sps:$4 sm:$0xff]   ;;  %v2687_v55 = vld [vmem:[#allocation5 + $0x274] ss:$24 sps:$4 sm:$0xff]   ;;  %v2693_v59 = vld [vmem:[#allocation5 + $0x2a4] ss:$24 sps:$4 sm:$0xff]  }
  0x4c   :  { %1354 = vmatprep.subr.bf16.mxu1 %v2641_v21  ;;  %1290 = vmatprep.mubr.bf16.mxu0 %v3213_v50  ;;  %v2691_v57 = vld [vmem:[#allocation5 + $0x270] ss:$24 sps:$4 sm:$0xff]   ;;  %v2695_v60 = vld [vmem:[#allocation5 + $0x2ac] ss:$24 sps:$4 sm:$0xff]   ;;  %v2701_v0 = vld [vmem:[#allocation5 + $0x2dc] ss:$24 sps:$4 sm:$0xff]  }
  0x4d   :  { %1376 = vmatprep.mubr.bf16.mxu1 %v3213_v50  ;;  %v2698_v62 = vld [vmem:[#allocation5 + $0x2a8] ss:$24 sps:$4 sm:$0xff]   ;;  %v2699_v63 = vld [vmem:[#allocation5 + $0x2d4] ss:$24 sps:$4 sm:$0xff]   ;;  %v2704_v2 = vld [vmem:[#allocation5 + $0x2d8] ss:$24 sps:$4 sm:$0xff]  }
  0x4e   :  { %1269 = vmatpush1.bf16.msra.mxu0 %v2643_v22  ;;  %v2703_v1 = vld [vmem:[#allocation5 + $0x2d0] ss:$24 sps:$4 sm:$0xff]   ;;  %v2707_v3 = vld [vmem:[#allocation5 + $0x304] ss:$24 sps:$4 sm:$0xff]   ;;  %v2705_v7 = vld [vmem:[#allocation5 + $0x300] ss:$24 sps:$4 sm:$0xff]  }
  0x4f   :  { %1355 = vmatpush1.bf16.msra.mxu1 %v2644_v23  ;;  %1270 = vmatprep.subr.bf16.mxu0 %v2645_v24  ;;  %v62_v4 = vld [vmem:[#allocation2] sm:$0xff]  ;;  %v2713_v10 = vld [vmem:[#allocation5 + $0x334] ss:$24 sps:$4 sm:$0xff]   ;;  %v2711_v12 = vld [vmem:[#allocation5 + $0x330] ss:$24 sps:$4 sm:$0xff]  }
  0x50   :  { %1356 = vmatprep.subr.bf16.mxu1 %v2647_v25  ;;  %v66_v5 = vld [vmem:[#allocation2 + $0x20] sm:$0xff]  ;;  %v2716_v11 = vld [vmem:[#allocation5 + $0x33c] ss:$24 sps:$4 sm:$0xff]   ;;  %v2714_v13 = vld [vmem:[#allocation5 + $0x338] ss:$24 sps:$4 sm:$0xff]  }
  0x51   :  { %v2710_v6 = vld [vmem:[#allocation5 + $0x30c] ss:$24 sps:$4 sm:$0xff]   ;;  %v2708_v8 = vld [vmem:[#allocation5 + $0x308] ss:$24 sps:$4 sm:$0xff]   ;;  %v3217_v9 = vpack.c.bf16 %v66_v5, %v62_v4  ;;  %v2728_v19 = vld [vmem:[#allocation5 + $0x39c] ss:$24 sps:$4 sm:$0xff]  }
  0x52   :  { %1271 = vmatpush1.bf16.msra.mxu0 %v2649_v26  ;;  %v2719_v14 = vld [vmem:[#allocation5 + $0x364] ss:$24 sps:$4 sm:$0xff]   ;;  %v2717_v16 = vld [vmem:[#allocation5 + $0x360] ss:$24 sps:$4 sm:$0xff]   ;;  %v2725_v18 = vld [vmem:[#allocation5 + $0x394] ss:$24 sps:$4 sm:$0xff]  }
  0x53   :  { %1357 = vmatpush1.bf16.msra.mxu1 %v2650_v27  ;;  %1272 = vmatprep.subr.bf16.mxu0 %v2651_v28  ;;  %v2722_v15 = vld [vmem:[#allocation5 + $0x36c] ss:$24 sps:$4 sm:$0xff]   ;;  %v2720_v17 = vld [vmem:[#allocation5 + $0x368] ss:$24 sps:$4 sm:$0xff]   ;;  %v2726_v21 = vld [vmem:[#allocation5 + $0x398] ss:$24 sps:$4 sm:$0xff]  }
  0x54   :  { %1358 = vmatprep.subr.bf16.mxu1 %v2653_v29  ;;  %v2723_v20 = vld [vmem:[#allocation5 + $0x390] ss:$24 sps:$4 sm:$0xff]   ;;  %v2731_v22 = vld [vmem:[#allocation5 + $0x3c4] ss:$24 sps:$4 sm:$0xff]   ;;  %v2729_v24 = vld [vmem:[#allocation5 + $0x3c0] ss:$24 sps:$4 sm:$0xff]  }
  0x55   :  { %v2734_v23 = vld [vmem:[#allocation5 + $0x3cc] ss:$24 sps:$4 sm:$0xff]   ;;  %v2732_v25 = vld [vmem:[#allocation5 + $0x3c8] ss:$24 sps:$4 sm:$0xff]   ;;  %v2740_v27 = vld [vmem:[#allocation5 + $0x3fc] ss:$24 sps:$4 sm:$0xff]  }
  0x56   :  { %1273 = vmatpush1.bf16.msra.mxu0 %v2655_v30  ;;  %v2737_v26 = vld [vmem:[#allocation5 + $0x3f4] ss:$24 sps:$4 sm:$0xff]   ;;  %v2735_v28 = vld [vmem:[#allocation5 + $0x3f0] ss:$24 sps:$4 sm:$0xff]   ;;  %v2743_v30 = vld [vmem:[#allocation5 + $0x424] ss:$24 sps:$4 sm:$0xff]  }
  0x57   :  { %1359 = vmatpush1.bf16.msra.mxu1 %v2656_v31  ;;  %1274 = vmatprep.subr.bf16.mxu0 %v2657_v32  ;;  %v2738_v29 = vld [vmem:[#allocation5 + $0x3f8] ss:$24 sps:$4 sm:$0xff]   ;;  %v2746_v31 = vld [vmem:[#allocation5 + $0x42c] ss:$24 sps:$4 sm:$0xff]   ;;  %v2764_v46 = vld [vmem:[#allocation5 + $0x4bc] ss:$24 sps:$4 sm:$0xff]  }
  0x58   :  { %1360 = vmatprep.subr.bf16.mxu1 %v2659_v33  ;;  %v65_v32 = vld [vmem:[#allocation2 + $0x18] sm:$0xff]  ;;  %v2759_v47 = vld [vmem:[#allocation5 + $0x4b0] ss:$24 sps:$4 sm:$0xff]  }
  0x59   :  { %v2741_v33 = vld [vmem:[#allocation5 + $0x420] ss:$24 sps:$4 sm:$0xff]  }
  0x5a   :  { %1275 = vmatpush1.bf16.msra.mxu0 %v2661_v34  ;;  %v2744_v34 = vld [vmem:[#allocation5 + $0x428] ss:$24 sps:$4 sm:$0xff]  }
  0x5b   :  { %1361 = vmatpush1.bf16.msra.mxu1 %v2662_v35  ;;  %1276 = vmatprep.subr.bf16.mxu0 %v2663_v36  ;;  %v69_v35 = vld [vmem:[#allocation2 + $0x38] sm:$0xff]  ;;  %v2749_v36 = vld [vmem:[#allocation5 + $0x454] ss:$24 sps:$4 sm:$0xff]   ;;  %v2792_v5 = vld [vmem:[#allocation5 + $0x5a8] ss:$24 sps:$4 sm:$0xff]  }
  0x5c   :  { %1362 = vmatprep.subr.bf16.mxu1 %v2665_v37  ;;  %v3221_v37 = vpack.c.bf16 %v69_v35, %v65_v32  ;;  %v2789_v4 = vld [vmem:[#allocation5 + $0x5a0] ss:$24 sps:$4 sm:$0xff]   ;;  %v2818_v32 = vld [vmem:[#allocation5 + $0x104] ss:$24 sps:$4 sm:$0xff]  }
  0x5d   :  { %v2914_v35 = vld [vmem:[#allocation7 + $0x54] ss:$8 sps:$4 sm:$0xff]  }
  0x5e   :  { %1277 = vmatpush1.bf16.msra.mxu0 %v2667_v38  ;;  %v2752_v38 = vld [vmem:[#allocation5 + $0x45c] ss:$24 sps:$4 sm:$0xff]  }
  0x5f   :  { %1363 = vmatpush1.bf16.msra.mxu1 %v2668_v39  ;;  %1278 = vmatprep.subr.bf16.mxu0 %v2669_v40  ;;  %v2747_v39 = vld [vmem:[#allocation5 + $0x450] ss:$24 sps:$4 sm:$0xff]  }
  0x60   :  { %1364 = vmatprep.subr.bf16.mxu1 %v2671_v41  ;;  %v2750_v40 = vld [vmem:[#allocation5 + $0x458] ss:$24 sps:$4 sm:$0xff]   ;;  %v2755_v41 = vld [vmem:[#allocation5 + $0x484] ss:$24 sps:$4 sm:$0xff]  }
  0x62   :  { %1279 = vmatpush1.bf16.msra.mxu0 %v2673_v42  ;;  %v2758_v42 = vld [vmem:[#allocation5 + $0x48c] ss:$24 sps:$4 sm:$0xff]  }
  0x63   :  { %1365 = vmatpush1.bf16.msra.mxu1 %v2674_v43  ;;  %1280 = vmatprep.subr.bf16.mxu0 %v2675_v44  ;;  %v2753_v43 = vld [vmem:[#allocation5 + $0x480] ss:$24 sps:$4 sm:$0xff]  }
  0x64   :  { %1366 = vmatprep.subr.bf16.mxu1 %v2677_v45  ;;  %v2756_v44 = vld [vmem:[#allocation5 + $0x488] ss:$24 sps:$4 sm:$0xff]   ;;  %v2761_v45 = vld [vmem:[#allocation5 + $0x4b4] ss:$24 sps:$4 sm:$0xff]  }
  0x66   :  { %1281 = vmatpush1.bf16.msra.mxu0 %v2679_v48  ;;  %v2762_v48 = vld [vmem:[#allocation5 + $0x4b8] ss:$24 sps:$4 sm:$0xff]  }
  0x67   :  { %1367 = vmatpush1.bf16.msra.mxu1 %v2680_v49  ;;  %1282 = vmatprep.subr.bf16.mxu0 %v2681_v51  ;;  %v2767_v49 = vld [vmem:[#allocation5 + $0x4e4] ss:$24 sps:$4 sm:$0xff]  }
  0x68   :  { %1368 = vmatprep.subr.bf16.mxu1 %v2683_v52  ;;  %v2770_v51 = vld [vmem:[#allocation5 + $0x4ec] ss:$24 sps:$4 sm:$0xff]   ;;  %v2765_v52 = vld [vmem:[#allocation5 + $0x4e0] ss:$24 sps:$4 sm:$0xff]  }
  0x6a   :  { %1283 = vmatpush1.bf16.msra.mxu0 %v2685_v53  ;;  %v2768_v53 = vld [vmem:[#allocation5 + $0x4e8] ss:$24 sps:$4 sm:$0xff]  }
  0x6b   :  { %1369 = vmatpush1.bf16.msra.mxu1 %v2686_v54  ;;  %1284 = vmatprep.subr.bf16.mxu0 %v2687_v55  ;;  %v2773_v54 = vld [vmem:[#allocation5 + $0x514] ss:$24 sps:$4 sm:$0xff]  }
  0x6c   :  { %1370 = vmatprep.subr.bf16.mxu1 %v2689_v56  ;;  %v2776_v55 = vld [vmem:[#allocation5 + $0x51c] ss:$24 sps:$4 sm:$0xff]   ;;  %v2771_v56 = vld [vmem:[#allocation5 + $0x510] ss:$24 sps:$4 sm:$0xff]  }
  0x6e   :  { %1285 = vmatpush1.bf16.msra.mxu0 %v2691_v57  ;;  %v2774_v57 = vld [vmem:[#allocation5 + $0x518] ss:$24 sps:$4 sm:$0xff]  }
  0x6f   :  { %1371 = vmatpush1.bf16.msra.mxu1 %v2692_v58  ;;  %1286 = vmatprep.subr.bf16.mxu0 %v2693_v59  ;;  %v2779_v58 = vld [vmem:[#allocation5 + $0x544] ss:$24 sps:$4 sm:$0xff]  }
  0x70   :  { %1372 = vmatprep.subr.bf16.mxu1 %v2695_v60  ;;  %v2782_v59 = vld [vmem:[#allocation5 + $0x54c] ss:$24 sps:$4 sm:$0xff]   ;;  %v2777_v60 = vld [vmem:[#allocation5 + $0x540] ss:$24 sps:$4 sm:$0xff]  }
  0x72   :  { %1287 = vmatpush1.bf16.msra.mxu0 %v2697_v61  ;;  %v2780_v61 = vld [vmem:[#allocation5 + $0x548] ss:$24 sps:$4 sm:$0xff]  }
  0x73   :  { %1373 = vmatpush1.bf16.msra.mxu1 %v2698_v62  ;;  %1288 = vmatprep.subr.bf16.mxu0 %v2699_v63  ;;  %v2785_v62 = vld [vmem:[#allocation5 + $0x574] ss:$24 sps:$4 sm:$0xff]  }
  0x74   :  { %1374 = vmatprep.subr.bf16.mxu1 %v2701_v0  ;;  %v2788_v63 = vld [vmem:[#allocation5 + $0x57c] ss:$24 sps:$4 sm:$0xff]   ;;  %v2783_v0 = vld [vmem:[#allocation5 + $0x570] ss:$24 sps:$4 sm:$0xff]  }
  0x76   :  { %1289 = vmatpush1.bf16.msra.mxu0 %v2703_v1  ;;  %v2786_v1 = vld [vmem:[#allocation5 + $0x578] ss:$24 sps:$4 sm:$0xff]  }
  0x77   :  { %1375 = vmatpush1.bf16.msra.mxu1 %v2704_v2  ;;  %1301 = vmatprep.subr.bf16.mxu0 %v2707_v3  ;;  %v2791_v2 = vld [vmem:[#allocation5 + $0x5a4] ss:$24 sps:$4 sm:$0xff]  }
  0x78   :  { %1387 = vmatprep.subr.bf16.mxu1 %v2710_v6  ;;  %v2794_v3 = vld [vmem:[#allocation5 + $0x5ac] ss:$24 sps:$4 sm:$0xff]  }
  0x79   :  { %1291 = vmatmul.mubr.bf16.vlgmr.msra.gmra.mrb[0].mxu0 %v3217_v9  ;;  %v2797_v6 = vld [vmem:[#allocation5 + $0x5d4] ss:$24 sps:$4 sm:$0xff]  }
  0x7a   :  { %1377 = vmatmul.mubr.bf16.vlgmr.msra.gmra.mrb[0].mxu1 %v3217_v9  ;;  %1302 = vmatpush1.bf16.msra.mxu0 %v2705_v7  ;;  %v2800_v7 = vld [vmem:[#allocation5 + $0x5dc] ss:$24 sps:$4 sm:$0xff]  }
  0x7b   :  { %1388 = vmatpush1.bf16.msra.mxu1 %v2708_v8  ;;  %1303 = vmatprep.subr.bf16.mxu0 %v2713_v10  ;;  %v2795_v8 = vld [vmem:[#allocation5 + $0x5d0] ss:$24 sps:$4 sm:$0xff]  }
  0x7c   :  { %1389 = vmatprep.subr.bf16.mxu1 %v2716_v11  ;;  %1333 = vmatprep.mubr.bf16.mxu0 %v3221_v37  ;;  %v2798_v10 = vld [vmem:[#allocation5 + $0x5d8] ss:$24 sps:$4 sm:$0xff]  }
  0x7d   :  { %1419 = vmatprep.mubr.bf16.mxu1 %v3221_v37  ;;  %v64_v11 = vld [vmem:[#allocation2 + $0x10] sm:$0xff] }
  0x7e   :  { %1304 = vmatpush1.bf16.msra.mxu0 %v2711_v12  ;;  %v68_v12 = vld [vmem:[#allocation2 + $0x30] sm:$0xff] }
  0x7f   :  { %1390 = vmatpush1.bf16.msra.mxu1 %v2714_v13  ;;  %1305 = vmatprep.subr.bf16.mxu0 %v2719_v14  ;;  %v2803_v13 = vld [vmem:[#allocation5 + $0x14] ss:$24 sps:$4 sm:$0xff]   ;;  %v3225_v14 = vpack.c.bf16 %v68_v12, %v64_v11  ;;  %v2846_v11 = vld [vmem:[#allocation5 + $0x2e0] ss:$24 sps:$4 sm:$0xff]  }
  0x80   :  { %1391 = vmatprep.subr.bf16.mxu1 %v2722_v15  ;;  %v2801_v15 = vld [vmem:[#allocation5 + $0x10] ss:$24 sps:$4 sm:$0xff]   ;;  %v2851_v12 = vld [vmem:[#allocation5 + $0x314] ss:$24 sps:$4 sm:$0xff]  }
  0x82   :  { %1306 = vmatpush1.bf16.msra.mxu0 %v2717_v16  ;;  %v2806_v16 = vld [vmem:[#allocation5 + $0x44] ss:$24 sps:$4 sm:$0xff]  }
  0x83   :  { %1392 = vmatpush1.bf16.msra.mxu1 %v2720_v17  ;;  %1307 = vmatprep.subr.bf16.mxu0 %v2725_v18  ;;  %v2804_v17 = vld [vmem:[#allocation5 + $0x40] ss:$24 sps:$4 sm:$0xff]  }
  0x84   :  { %1393 = vmatprep.subr.bf16.mxu1 %v2728_v19  ;;  %v2897_v18 = vld [vmem:[#allocation7] ss:$8 sps:$4 sm:$0xff]   ;;  %v2899_v19 = vld [vmem:[#allocation7 + $0x4] ss:$8 sps:$4 sm:$0xff]  }
  0x86   :  { %1308 = vmatpush1.bf16.msra.mxu0 %v2723_v20  ;;  %v2809_v20 = vld [vmem:[#allocation5 + $0x74] ss:$24 sps:$4 sm:$0xff]  }
  0x87   :  { %1394 = vmatpush1.bf16.msra.mxu1 %v2726_v21  ;;  %1309 = vmatprep.subr.bf16.mxu0 %v2731_v22  ;;  %v2902_v21 = vld [vmem:[#allocation7 + $0x14] ss:$8 sps:$4 sm:$0xff]   ;;  %v2900_v22 = vld [vmem:[#allocation7 + $0x10] ss:$8 sps:$4 sm:$0xff]  }
  0x88   :  { %1395 = vmatprep.subr.bf16.mxu1 %v2734_v23  ;;  %v2905_v23 = vld [vmem:[#allocation7 + $0x24] ss:$8 sps:$4 sm:$0xff]  }
  0x8a   :  { %1310 = vmatpush1.bf16.msra.mxu0 %v2729_v24  ;;  %v2807_v24 = vld [vmem:[#allocation5 + $0x70] ss:$24 sps:$4 sm:$0xff]  }
  0x8b   :  { %1396 = vmatpush1.bf16.msra.mxu1 %v2732_v25  ;;  %1311 = vmatprep.subr.bf16.mxu0 %v2737_v26  ;;  %v2812_v25 = vld [vmem:[#allocation5 + $0xa4] ss:$24 sps:$4 sm:$0xff]   ;;  %v2903_v26 = vld [vmem:[#allocation7 + $0x20] ss:$8 sps:$4 sm:$0xff]  }
  0x8c   :  { %1397 = vmatprep.subr.bf16.mxu1 %v2740_v27  ;;  %v2908_v27 = vld [vmem:[#allocation7 + $0x34] ss:$8 sps:$4 sm:$0xff]  }
  0x8e   :  { %1312 = vmatpush1.bf16.msra.mxu0 %v2735_v28  ;;  %v2810_v28 = vld [vmem:[#allocation5 + $0xa0] ss:$24 sps:$4 sm:$0xff]  }
  0x8f   :  { %1398 = vmatpush1.bf16.msra.mxu1 %v2738_v29  ;;  %1313 = vmatprep.subr.bf16.mxu0 %v2743_v30  ;;  %v2815_v29 = vld [vmem:[#allocation5 + $0xd4] ss:$24 sps:$4 sm:$0xff]  }
  0x90   :  { %1399 = vmatprep.subr.bf16.mxu1 %v2746_v31  ;;  %v2911_v30 = vld [vmem:[#allocation7 + $0x44] ss:$8 sps:$4 sm:$0xff]   ;;  %v2813_v31 = vld [vmem:[#allocation5 + $0xd0] ss:$24 sps:$4 sm:$0xff]  }
  0x92   :  { %1314 = vmatpush1.bf16.msra.mxu0 %v2741_v33  ;;  %v2909_v33 = vld [vmem:[#allocation7 + $0x40] ss:$8 sps:$4 sm:$0xff]  }
  0x93   :  { %1400 = vmatpush1.bf16.msra.mxu1 %v2744_v34  ;;  %1315 = vmatprep.subr.bf16.mxu0 %v2749_v36  ;;  %v2816_v34 = vld [vmem:[#allocation5 + $0x100] ss:$24 sps:$4 sm:$0xff]   ;;  %v2821_v36 = vld [vmem:[#allocation5 + $0x134] ss:$24 sps:$4 sm:$0xff]  }
  0x94   :  { %1401 = vmatprep.subr.bf16.mxu1 %v2752_v38  ;;  %v2912_v38 = vld [vmem:[#allocation7 + $0x50] ss:$8 sps:$4 sm:$0xff]  }
  0x96   :  { %1316 = vmatpush1.bf16.msra.mxu0 %v2747_v39  ;;  %v2917_v39 = vld [vmem:[#allocation7 + $0x64] ss:$8 sps:$4 sm:$0xff]  }
  0x97   :  { %1402 = vmatpush1.bf16.msra.mxu1 %v2750_v40  ;;  %1317 = vmatprep.subr.bf16.mxu0 %v2755_v41  ;;  %v2819_v40 = vld [vmem:[#allocation5 + $0x130] ss:$24 sps:$4 sm:$0xff]   ;;  %v2824_v41 = vld [vmem:[#allocation5 + $0x164] ss:$24 sps:$4 sm:$0xff]  }
  0x98   :  { %1403 = vmatprep.subr.bf16.mxu1 %v2758_v42  ;;  %v2915_v42 = vld [vmem:[#allocation7 + $0x60] ss:$8 sps:$4 sm:$0xff]  }
  0x9a   :  { %1318 = vmatpush1.bf16.msra.mxu0 %v2753_v43  ;;  %v2920_v43 = vld [vmem:[#allocation7 + $0x74] ss:$8 sps:$4 sm:$0xff]  }
  0x9b   :  { %1404 = vmatpush1.bf16.msra.mxu1 %v2756_v44  ;;  %1319 = vmatprep.subr.bf16.mxu0 %v2761_v45  ;;  %v2822_v44 = vld [vmem:[#allocation5 + $0x160] ss:$24 sps:$4 sm:$0xff]   ;;  %v2827_v45 = vld [vmem:[#allocation5 + $0x194] ss:$24 sps:$4 sm:$0xff]  }
  0x9c   :  { %1405 = vmatprep.subr.bf16.mxu1 %v2764_v46  ;;  %v2918_v46 = vld [vmem:[#allocation7 + $0x70] ss:$8 sps:$4 sm:$0xff]  }
  0x9e   :  { %1320 = vmatpush1.bf16.msra.mxu0 %v2759_v47  ;;  %v2923_v47 = vld [vmem:[#allocation7 + $0x84] ss:$8 sps:$4 sm:$0xff]  }
  0x9f   :  { %1406 = vmatpush1.bf16.msra.mxu1 %v2762_v48  ;;  %1321 = vmatprep.subr.bf16.mxu0 %v2767_v49  ;;  %v2825_v48 = vld [vmem:[#allocation5 + $0x190] ss:$24 sps:$4 sm:$0xff]   ;;  %v2830_v49 = vld [vmem:[#allocation5 + $0x1c4] ss:$24 sps:$4 sm:$0xff]  }
  0xa0   :  { %1407 = vmatprep.subr.bf16.mxu1 %v2770_v51  ;;  %v2921_v51 = vld [vmem:[#allocation7 + $0x80] ss:$8 sps:$4 sm:$0xff]  }
  0xa2   :  { %1322 = vmatpush1.bf16.msra.mxu0 %v2765_v52  ;;  %v2926_v52 = vld [vmem:[#allocation7 + $0x94] ss:$8 sps:$4 sm:$0xff]  }
  0xa3   :  { %1408 = vmatpush1.bf16.msra.mxu1 %v2768_v53  ;;  %1323 = vmatprep.subr.bf16.mxu0 %v2773_v54  ;;  %v2828_v53 = vld [vmem:[#allocation5 + $0x1c0] ss:$24 sps:$4 sm:$0xff]   ;;  %v2833_v54 = vld [vmem:[#allocation5 + $0x1f4] ss:$24 sps:$4 sm:$0xff]  }
  0xa4   :  { %1409 = vmatprep.subr.bf16.mxu1 %v2776_v55  ;;  %v2924_v55 = vld [vmem:[#allocation7 + $0x90] ss:$8 sps:$4 sm:$0xff]  }
  0xa6   :  { %1324 = vmatpush1.bf16.msra.mxu0 %v2771_v56  ;;  %v2929_v56 = vld [vmem:[#allocation7 + $0xa4] ss:$8 sps:$4 sm:$0xff]  }
  0xa7   :  { %1410 = vmatpush1.bf16.msra.mxu1 %v2774_v57  ;;  %1325 = vmatprep.subr.bf16.mxu0 %v2779_v58  ;;  %v2831_v57 = vld [vmem:[#allocation5 + $0x1f0] ss:$24 sps:$4 sm:$0xff]   ;;  %v2836_v58 = vld [vmem:[#allocation5 + $0x224] ss:$24 sps:$4 sm:$0xff]  }
  0xa8   :  { %1411 = vmatprep.subr.bf16.mxu1 %v2782_v59  ;;  %v2927_v59 = vld [vmem:[#allocation7 + $0xa0] ss:$8 sps:$4 sm:$0xff]  }
  0xaa   :  { %1326 = vmatpush1.bf16.msra.mxu0 %v2777_v60  ;;  %v2932_v60 = vld [vmem:[#allocation7 + $0xb4] ss:$8 sps:$4 sm:$0xff]  }
  0xab   :  { %1412 = vmatpush1.bf16.msra.mxu1 %v2780_v61  ;;  %1327 = vmatprep.subr.bf16.mxu0 %v2785_v62  ;;  %v2834_v61 = vld [vmem:[#allocation5 + $0x220] ss:$24 sps:$4 sm:$0xff]   ;;  %v2839_v62 = vld [vmem:[#allocation5 + $0x254] ss:$24 sps:$4 sm:$0xff]  }
  0xac   :  { %1413 = vmatprep.subr.bf16.mxu1 %v2788_v63  ;;  %v2930_v63 = vld [vmem:[#allocation7 + $0xb0] ss:$8 sps:$4 sm:$0xff]  }
  0xae   :  { %1328 = vmatpush1.bf16.msra.mxu0 %v2783_v0  ;;  %v2935_v0 = vld [vmem:[#allocation7 + $0xc4] ss:$8 sps:$4 sm:$0xff]  }
  0xaf   :  { %1414 = vmatpush1.bf16.msra.mxu1 %v2786_v1  ;;  %1329 = vmatprep.subr.bf16.mxu0 %v2791_v2  ;;  %v2837_v1 = vld [vmem:[#allocation5 + $0x250] ss:$24 sps:$4 sm:$0xff]   ;;  %v2842_v2 = vld [vmem:[#allocation5 + $0x284] ss:$24 sps:$4 sm:$0xff]  }
  0xb0   :  { %1415 = vmatprep.subr.bf16.mxu1 %v2794_v3  ;;  %v2933_v3 = vld [vmem:[#allocation7 + $0xc0] ss:$8 sps:$4 sm:$0xff]  }
  0xb2   :  { %1330 = vmatpush1.bf16.msra.mxu0 %v2789_v4  ;;  %v2938_v4 = vld [vmem:[#allocation7 + $0xd4] ss:$8 sps:$4 sm:$0xff]  }
  0xb3   :  { %1416 = vmatpush1.bf16.msra.mxu1 %v2792_v5  ;;  %1331 = vmatprep.subr.bf16.mxu0 %v2797_v6  ;;  %v2840_v5 = vld [vmem:[#allocation5 + $0x280] ss:$24 sps:$4 sm:$0xff]   ;;  %v2845_v6 = vld [vmem:[#allocation5 + $0x2b4] ss:$24 sps:$4 sm:$0xff]  }
  0xb4   :  { %1417 = vmatprep.subr.bf16.mxu1 %v2800_v7  ;;  %v2936_v7 = vld [vmem:[#allocation7 + $0xd0] ss:$8 sps:$4 sm:$0xff]  }
  0xb6   :  { %1332 = vmatpush1.bf16.msra.mxu0 %v2795_v8  ;;  %v2843_v8 = vld [vmem:[#allocation5 + $0x2b0] ss:$24 sps:$4 sm:$0xff]  }
  0xb7   :  { %1418 = vmatpush1.bf16.msra.mxu1 %v2798_v10  ;;  %1430 = vmatprep.subr.bf16.mxu0 %v2803_v13  ;;  %v2848_v10 = vld [vmem:[#allocation5 + $0x2e4] ss:$24 sps:$4 sm:$0xff]   ;;  %v2849_v13 = vld [vmem:[#allocation5 + $0x310] ss:$24 sps:$4 sm:$0xff]  }
  0xb8   :  { %2122 = vmatprep.subr.bf16.mxu1 %v2899_v19  ;;  %v2860_v19 = vld [vmem:[#allocation5 + $0x3a4] ss:$24 sps:$4 sm:$0xff]  }
  0xb9   :  { %1334 = vmatmul.mubr.bf16.vlgmr.msra.gmra.mrb[0].mxu0 %v3225_v14 }
  0xba   :  { %1420 = vmatmul.mubr.bf16.vlgmr.msra.gmra.mrb[0].mxu1 %v3225_v14  ;;  %1431 = vmatpush1.bf16.msra.mxu0 %v2801_v15  ;;  %v2854_v15 = vld [vmem:[#allocation5 + $0x344] ss:$24 sps:$4 sm:$0xff]  }
  0xbb   :  { %1462 = vmatprep.mubr.bf16.mxu0 %v3213_v50  ;;  %1432 = vmatprep.subr.bf16.mxu0 %v2806_v16  ;;  %v2906_v50 = vld [vmem:[#allocation7 + $0x30] ss:$8 sps:$4 sm:$0xff]  }
  0xbc   :  { %2123 = vmatpush1.bf16.msra.mxu1 %v2897_v18  ;;  %v2852_v16 = vld [vmem:[#allocation5 + $0x340] ss:$24 sps:$4 sm:$0xff]   ;;  %v2855_v18 = vld [vmem:[#allocation5 + $0x370] ss:$24 sps:$4 sm:$0xff]  }
  0xbd   :  { %2124 = vmatprep.subr.bf16.mxu1 %v2902_v21  ;;  %v2863_v21 = vld [vmem:[#allocation5 + $0x3d4] ss:$24 sps:$4 sm:$0xff]  }
  0xbe   :  { %1433 = vmatpush1.bf16.msra.mxu0 %v2804_v17  ;;  %v2857_v17 = vld [vmem:[#allocation5 + $0x374] ss:$24 sps:$4 sm:$0xff]  }
  0xbf   :  { %1434 = vmatprep.subr.bf16.mxu0 %v2809_v20  ;;  %v2858_v20 = vld [vmem:[#allocation5 + $0x3a0] ss:$24 sps:$4 sm:$0xff]  }
  0xc0   :  { %2125 = vmatpush1.bf16.msra.mxu1 %v2900_v22  ;;  %v2861_v22 = vld [vmem:[#allocation5 + $0x3d0] ss:$24 sps:$4 sm:$0xff]  }
  0xc1   :  { %2126 = vmatprep.subr.bf16.mxu1 %v2905_v23  ;;  %v2866_v23 = vld [vmem:[#allocation5 + $0x404] ss:$24 sps:$4 sm:$0xff]  }
  0xc2   :  { %1435 = vmatpush1.bf16.msra.mxu0 %v2807_v24  ;;  %v2869_v24 = vld [vmem:[#allocation5 + $0x434] ss:$24 sps:$4 sm:$0xff]  }
  0xc3   :  { %1436 = vmatprep.subr.bf16.mxu0 %v2812_v25  ;;  %v2941_v25 = vld [vmem:[#allocation7 + $0xe4] ss:$8 sps:$4 sm:$0xff]  }
  0xc4   :  { %2127 = vmatpush1.bf16.msra.mxu1 %v2903_v26  ;;  %v2867_v26 = vld [vmem:[#allocation5 + $0x430] ss:$24 sps:$4 sm:$0xff]  }
  0xc5   :  { %2128 = vmatprep.subr.bf16.mxu1 %v2908_v27  ;;  %v2872_v27 = vld [vmem:[#allocation5 + $0x464] ss:$24 sps:$4 sm:$0xff]  }
  0xc6   :  { %1437 = vmatpush1.bf16.msra.mxu0 %v2810_v28  ;;  %v2944_v28 = vld [vmem:[#allocation7 + $0xf4] ss:$8 sps:$4 sm:$0xff]  }
  0xc7   :  { %1438 = vmatprep.subr.bf16.mxu0 %v2815_v29  ;;  %v2942_v29 = vld [vmem:[#allocation7 + $0xf0] ss:$8 sps:$4 sm:$0xff]  }
  0xc8   :  { %2129 = vmatpush1.bf16.msra.mxu1 %v2906_v50  ;;  %v2870_v50 = vld [vmem:[#allocation5 + $0x460] ss:$24 sps:$4 sm:$0xff]  }
  0xc9   :  { %2130 = vmatprep.subr.bf16.mxu1 %v2911_v30  ;;  %v2875_v30 = vld [vmem:[#allocation5 + $0x494] ss:$24 sps:$4 sm:$0xff]  }
  0xca   :  { %1439 = vmatpush1.bf16.msra.mxu0 %v2813_v31  ;;  %v2947_v31 = vld [vmem:[#allocation7 + $0x104] ss:$8 sps:$4 sm:$0xff]  }
  0xcb   :  { %1440 = vmatprep.subr.bf16.mxu0 %v2818_v32  ;;  %v2873_v32 = vld [vmem:[#allocation5 + $0x490] ss:$24 sps:$4 sm:$0xff]  }
  0xcc   :  { %2131 = vmatpush1.bf16.msra.mxu1 %v2909_v33  ;;  %v2878_v33 = vld [vmem:[#allocation5 + $0x4c4] ss:$24 sps:$4 sm:$0xff]  }
  0xcd   :  { %2132 = vmatprep.subr.bf16.mxu1 %v2914_v35  ;;  %v2881_v35 = vld [vmem:[#allocation5 + $0x4f4] ss:$24 sps:$4 sm:$0xff]  }
  0xce   :  { %1441 = vmatpush1.bf16.msra.mxu0 %v2816_v34  ;;  %v2876_v34 = vld [vmem:[#allocation5 + $0x4c0] ss:$24 sps:$4 sm:$0xff]  }
  0xcf   :  { %1442 = vmatprep.subr.bf16.mxu0 %v2821_v36  ;;  %v2879_v36 = vld [vmem:[#allocation5 + $0x4f0] ss:$24 sps:$4 sm:$0xff]  }
  0xd0   :  { %2133 = vmatpush1.bf16.msra.mxu1 %v2912_v38  ;;  %v2884_v38 = vld [vmem:[#allocation5 + $0x524] ss:$24 sps:$4 sm:$0xff]  }
  0xd1   :  { %2134 = vmatprep.subr.bf16.mxu1 %v2917_v39  ;;  %v2882_v39 = vld [vmem:[#allocation5 + $0x520] ss:$24 sps:$4 sm:$0xff]  }
  0xd2   :  { %1443 = vmatpush1.bf16.msra.mxu0 %v2819_v40  ;;  %v2887_v40 = vld [vmem:[#allocation5 + $0x554] ss:$24 sps:$4 sm:$0xff]  }
  0xd3   :  { %1444 = vmatprep.subr.bf16.mxu0 %v2824_v41  ;;  %v2885_v41 = vld [vmem:[#allocation5 + $0x550] ss:$24 sps:$4 sm:$0xff]  }
  0xd4   :  { %2135 = vmatpush1.bf16.msra.mxu1 %v2915_v42  ;;  %v2890_v42 = vld [vmem:[#allocation5 + $0x584] ss:$24 sps:$4 sm:$0xff]  }
  0xd5   :  { %2136 = vmatprep.subr.bf16.mxu1 %v2920_v43  ;;  %v2888_v43 = vld [vmem:[#allocation5 + $0x580] ss:$24 sps:$4 sm:$0xff]  }
  0xd6   :  { %1445 = vmatpush1.bf16.msra.mxu0 %v2822_v44  ;;  %v2893_v44 = vld [vmem:[#allocation5 + $0x5b4] ss:$24 sps:$4 sm:$0xff]  }
  0xd7   :  { %1446 = vmatprep.subr.bf16.mxu0 %v2827_v45  ;;  %v2891_v45 = vld [vmem:[#allocation5 + $0x5b0] ss:$24 sps:$4 sm:$0xff]  }
  0xd8   :  { %2137 = vmatpush1.bf16.msra.mxu1 %v2918_v46  ;;  %v2896_v46 = vld [vmem:[#allocation5 + $0x5e4] ss:$24 sps:$4 sm:$0xff]  }
  0xd9   :  { %2138 = vmatprep.subr.bf16.mxu1 %v2923_v47  ;;  %v2894_v47 = vld [vmem:[#allocation5 + $0x5e0] ss:$24 sps:$4 sm:$0xff]  }
  0xda   :  { %1447 = vmatpush1.bf16.msra.mxu0 %v2825_v48  ;;  %v268_v48 = vlaneseq }
  0xdb   :  { %1448 = vmatprep.subr.bf16.mxu0 %v2830_v49 }
  0xdc   :  { %2139 = vmatpush1.bf16.msra.mxu1 %v2921_v51  ;;  %v3233_v49 = vshrl.u32 %v268_v48, 7  ;;  %v2986_v48 = vld [vmem:[#allocation7 + $0x1d4] ss:$8 sps:$4 sm:$0xff]  }
  0xdd   :  { %2140 = vmatprep.subr.bf16.mxu1 %v2926_v52 }
  0xde   :  { %1449 = vmatpush1.bf16.msra.mxu0 %v2828_v53  ;;  %v270_v51 = vsub.s32 0, %v3233_v49  ;;  %v278_v52 = vsub.s32 2, %v3233_v49  ;;  %v3240_v53 = vld [vmem:[%s3280_s2] sm:$0x3f] }
  0xdf   :  { %1450 = vmatprep.subr.bf16.mxu0 %v2833_v54  ;;  %v274_v54 = vsub.s32 1, %v3233_v49 }
  0xe0   :  { %2141 = vmatpush1.bf16.msra.mxu1 %v2924_v55  ;;  %v282_v55 = vsub.s32 3, %v3233_v49 }
  0xe1   :  { %2142 = vmatprep.subr.bf16.mxu1 %v2929_v56  ;;  %v279_v56 = vrot.slane %v3240_v53, %v278_v52  ;;  %v2984_v52 = vld [vmem:[#allocation7 + $0x1d0] ss:$8 sps:$4 sm:$0xff]  }
  0xe2   :  { %1451 = vmatpush1.bf16.msra.mxu0 %v2831_v57  ;;  %v275_v57 = vrot.slane %v3240_v53, %v274_v54 }
  0xe3   :  { %1452 = vmatprep.subr.bf16.mxu0 %v2836_v58  ;;  %v283_v58 = vrot.slane %v3240_v53, %v282_v55  ;;  %v2989_v55 = vld [vmem:[#allocation7 + $0x1e4] ss:$8 sps:$4 sm:$0xff]  }
  0xe4   :  { %2143 = vmatpush1.bf16.msra.mxu1 %v2927_v59 }
  0xe5   :  { %2144 = vmatprep.subr.bf16.mxu1 %v2932_v60 }
  0xe6   :  { %1453 = vmatpush1.bf16.msra.mxu0 %v2834_v61 }
  0xe7   :  { %1454 = vmatprep.subr.bf16.mxu0 %v2839_v62 }
  0xe8   :  { %2145 = vmatpush1.bf16.msra.mxu1 %v2930_v63 }
  0xe9   :  { %2146 = vmatprep.subr.bf16.mxu1 %v2935_v0 }
  0xea   :  { %1455 = vmatpush1.bf16.msra.mxu0 %v2837_v1 }
  0xeb   :  { %1456 = vmatprep.subr.bf16.mxu0 %v2842_v2 }
  0xec   :  { %2147 = vmatpush1.bf16.msra.mxu1 %v2933_v3 }
  0xed   :  { %2148 = vmatprep.subr.bf16.mxu1 %v2938_v4 }
  0xee   :  { %1457 = vmatpush1.bf16.msra.mxu0 %v2840_v5 }
  0xef   :  { %1458 = vmatprep.subr.bf16.mxu0 %v2845_v6 }
  0xf0   :  { %2149 = vmatpush1.bf16.msra.mxu1 %v2936_v7 }
  0xf1   :  { %2150 = vmatprep.subr.bf16.mxu1 %v2941_v25  ;;  %v2950_v25 = vld [vmem:[#allocation7 + $0x114] ss:$8 sps:$4 sm:$0xff]  }
  0xf2   :  { %1459 = vmatpush1.bf16.msra.mxu0 %v2843_v8 }
  0xf3   :  { %1460 = vmatprep.subr.bf16.mxu0 %v2848_v10 }
  0xf6   :  { %1461 = vmatpush1.bf16.msra.mxu0 %v2846_v11 }
  0xf7   :  { %1473 = vmatprep.subr.bf16.mxu0 %v2851_v12 }
  0xf9   :  { %1463 = vmatmul.mubr.bf16.vlgmr.msra.gmra.mrb[4].mxu0 %v3217_v9  ;;  %v2864_v9 = vld [vmem:[#allocation5 + $0x400] ss:$24 sps:$4 sm:$0xff]  }
  0xfa   :  { %1474 = vmatpush1.bf16.msra.mxu0 %v2849_v13  ;;  %1505 = vmatprep.mubr.bf16.mxu0 %v3221_v37  ;;  %v2939_v37 = vld [vmem:[#allocation7 + $0xe0] ss:$8 sps:$4 sm:$0xff]  }
  0xfb   :  { %1475 = vmatprep.subr.bf16.mxu0 %v2854_v15  ;;  %2151 = vmatpush1.bf16.msra.mxu1 %v2939_v37  ;;  %v2948_v37 = vld [vmem:[#allocation7 + $0x110] ss:$8 sps:$4 sm:$0xff]  }
  0xfc   :  { %2152 = vmatprep.subr.bf16.mxu1 %v2944_v28  ;;  %v2956_v28 = vld [vmem:[#allocation7 + $0x134] ss:$8 sps:$4 sm:$0xff]  }
  0xfe   :  { %1476 = vmatpush1.bf16.msra.mxu0 %v2852_v16 }
  0xff   :  { %1477 = vmatprep.subr.bf16.mxu0 %v2857_v17  ;;  %2153 = vmatpush1.bf16.msra.mxu1 %v2942_v29  ;;  %v2954_v29 = vld [vmem:[#allocation7 + $0x130] ss:$8 sps:$4 sm:$0xff]  }
 0x100   :  { %2165 = vmatprep.subr.bf16.mxu1 %v2947_v31  ;;  %v2962_v31 = vld [vmem:[#allocation7 + $0x154] ss:$8 sps:$4 sm:$0xff]  }
 0x102   :  { %1478 = vmatpush1.bf16.msra.mxu0 %v2855_v18 }
 0x103   :  { %1479 = vmatprep.subr.bf16.mxu0 %v2860_v19 }
 0x106   :  { %1480 = vmatpush1.bf16.msra.mxu0 %v2858_v20 }
 0x107   :  { %1481 = vmatprep.subr.bf16.mxu0 %v2863_v21 }
 0x10a   :  { %1482 = vmatpush1.bf16.msra.mxu0 %v2861_v22 }
 0x10b   :  { %1483 = vmatprep.subr.bf16.mxu0 %v2866_v23 }
 0x10e   :  { %1484 = vmatpush1.bf16.msra.mxu0 %v2864_v9 }
 0x10f   :  { %1485 = vmatprep.subr.bf16.mxu0 %v2869_v24  ;;  %v2945_v24 = vld [vmem:[#allocation7 + $0x100] ss:$8 sps:$4 sm:$0xff]  }
 0x112   :  { %1486 = vmatpush1.bf16.msra.mxu0 %v2867_v26  ;;  %v2953_v26 = vld [vmem:[#allocation7 + $0x124] ss:$8 sps:$4 sm:$0xff]  }
 0x113   :  { %1487 = vmatprep.subr.bf16.mxu0 %v2872_v27  ;;  %v2951_v27 = vld [vmem:[#allocation7 + $0x120] ss:$8 sps:$4 sm:$0xff]  }
 0x116   :  { %1488 = vmatpush1.bf16.msra.mxu0 %v2870_v50  ;;  %v2959_v50 = vld [vmem:[#allocation7 + $0x144] ss:$8 sps:$4 sm:$0xff]  }
 0x117   :  { %1489 = vmatprep.subr.bf16.mxu0 %v2875_v30  ;;  %v2957_v30 = vld [vmem:[#allocation7 + $0x140] ss:$8 sps:$4 sm:$0xff]  }
 0x11a   :  { %1490 = vmatpush1.bf16.msra.mxu0 %v2873_v32  ;;  %v2960_v32 = vld [vmem:[#allocation7 + $0x150] ss:$8 sps:$4 sm:$0xff]  }
 0x11b   :  { %1491 = vmatprep.subr.bf16.mxu0 %v2878_v33  ;;  %v2965_v33 = vld [vmem:[#allocation7 + $0x164] ss:$8 sps:$4 sm:$0xff]  }
 0x11e   :  { %1492 = vmatpush1.bf16.msra.mxu0 %v2876_v34  ;;  %v2963_v34 = vld [vmem:[#allocation7 + $0x160] ss:$8 sps:$4 sm:$0xff]  }
 0x11f   :  { %1493 = vmatprep.subr.bf16.mxu0 %v2881_v35  ;;  %v2968_v35 = vld [vmem:[#allocation7 + $0x174] ss:$8 sps:$4 sm:$0xff]  }
 0x122   :  { %1494 = vmatpush1.bf16.msra.mxu0 %v2879_v36  ;;  %v2966_v36 = vld [vmem:[#allocation7 + $0x170] ss:$8 sps:$4 sm:$0xff]  }
 0x123   :  { %1495 = vmatprep.subr.bf16.mxu0 %v2884_v38  ;;  %v2971_v38 = vld [vmem:[#allocation7 + $0x184] ss:$8 sps:$4 sm:$0xff]  }
 0x126   :  { %1496 = vmatpush1.bf16.msra.mxu0 %v2882_v39  ;;  %v2969_v39 = vld [vmem:[#allocation7 + $0x180] ss:$8 sps:$4 sm:$0xff]  }
 0x127   :  { %1497 = vmatprep.subr.bf16.mxu0 %v2887_v40  ;;  %v2974_v40 = vld [vmem:[#allocation7 + $0x194] ss:$8 sps:$4 sm:$0xff]  }
 0x12a   :  { %1498 = vmatpush1.bf16.msra.mxu0 %v2885_v41  ;;  %v2972_v41 = vld [vmem:[#allocation7 + $0x190] ss:$8 sps:$4 sm:$0xff]  }
 0x12b   :  { %1499 = vmatprep.subr.bf16.mxu0 %v2890_v42  ;;  %v2977_v42 = vld [vmem:[#allocation7 + $0x1a4] ss:$8 sps:$4 sm:$0xff]  }
 0x12e   :  { %1500 = vmatpush1.bf16.msra.mxu0 %v2888_v43  ;;  %v2975_v43 = vld [vmem:[#allocation7 + $0x1a0] ss:$8 sps:$4 sm:$0xff]  }
 0x12f   :  { %1501 = vmatprep.subr.bf16.mxu0 %v2893_v44  ;;  %v2980_v44 = vld [vmem:[#allocation7 + $0x1b4] ss:$8 sps:$4 sm:$0xff]  }
 0x132   :  { %1502 = vmatpush1.bf16.msra.mxu0 %v2891_v45  ;;  %v2978_v45 = vld [vmem:[#allocation7 + $0x1b0] ss:$8 sps:$4 sm:$0xff]  }
 0x133   :  { %1503 = vmatprep.subr.bf16.mxu0 %v2896_v46  ;;  %v2983_v46 = vld [vmem:[#allocation7 + $0x1c4] ss:$8 sps:$4 sm:$0xff]  }
 0x136   :  { %1504 = vmatpush1.bf16.msra.mxu0 %v2894_v47  ;;  %v2981_v47 = vld [vmem:[#allocation7 + $0x1c0] ss:$8 sps:$4 sm:$0xff]  }
 0x139   :  { %1506 = vmatmul.mubr.bf16.vlgmr.msra.gmra.mrb[4].mxu0 %v3225_v14  ;;  %v271_v14 = vrot.slane %v3240_v53, %v270_v51 }
 0x18c   :  { %v1335_v59 = vpop.f32.mrb[0].mxu0 }
 0x18d   :  { %v1421_v60 = vpop.f32.mrb[0].mxu1  ;;  %v2561_v61 = vadd.f32 %v1335_v59, %v271_v14  ;;  %v1337_v63 = vpop.f32.mrb[1].mxu0  ;;  %v2993_v59 = vld [vmem:[#allocation7 + $0x200] ss:$8 sps:$4 sm:$0xff]  }
 0x18e   :  { %v2565_v62 = vadd.f32 %v1421_v60, %v279_v56  ;;  %v1423_v0 = vpop.f32.mrb[1].mxu1  ;;  %v2562_v1 = vadd.f32 %v1337_v63, %v275_v57  ;;  %v1339_v3 = vpop.f32.mrb[2].mxu0  ;;  %v2998_v60 = vld [vmem:[#allocation7 + $0x214] ss:$8 sps:$4 sm:$0xff]   ;;  %v2999_v63 = vld [vmem:[#allocation7 + $0x220] ss:$8 sps:$4 sm:$0xff]  }
 0x18f   :  { %v2566_v2 = vadd.f32 %v1423_v0, %v283_v58  ;;  %v1425_v4 = vpop.f32.mrb[2].mxu1  ;;  %v2563_v6 = vadd.f32 %v1339_v3, %v271_v14  ;;  %v1341_v8 = vpop.f32.mrb[3].mxu0  ;;  %v1516_v15 = vmax.f32 %v2561_v61, 0.0  ;;  %v2987_v14 = vld [vmem:[#allocation7 + $0x1e0] ss:$8 sps:$4 sm:$0xff]  }
 0x190   :  { %v1518_v5 = vmax.f32 %v2565_v62, 0.0  ;;  %v2567_v7 = vadd.f32 %v1425_v4, %v279_v56  ;;  %v1427_v10 = vpop.f32.mrb[3].mxu1  ;;  %v2564_v12 = vadd.f32 %v1341_v8, %v275_v57  ;;  %v1517_v18 = vmax.f32 %v2562_v1, 0.0  ;;  %v2992_v56 = vld [vmem:[#allocation7 + $0x1f4] ss:$8 sps:$4 sm:$0xff]  }
 0x191   :  { %v1519_v11 = vmax.f32 %v2566_v2, 0.0  ;;  %v2568_v13 = vadd.f32 %v1427_v10, %v283_v58  ;;  %v1522_v16 = vmax.f32 %v2563_v6, 0.0  ;;  %v2990_v57 = vld [vmem:[#allocation7 + $0x1f0] ss:$8 sps:$4 sm:$0xff]   ;;  %v2995_v58 = vld [vmem:[#allocation7 + $0x204] ss:$8 sps:$4 sm:$0xff]  }
 0x192   :  { %v1524_v17 = vmax.f32 %v2567_v7, 0.0  ;;  %v1523_v19 = vmax.f32 %v2564_v12, 0.0  ;;  %v2996_v61 = vld [vmem:[#allocation7 + $0x210] ss:$8 sps:$4 sm:$0xff]   ;;  %v3001_v62 = vld [vmem:[#allocation7 + $0x224] ss:$8 sps:$4 sm:$0xff]  }
 0x193   :  { %v1525_v20 = vmax.f32 %v2568_v13, 0.0  ;;  %v1528_v21 = vpack.c.bf16 %v1522_v16, %v1516_v15  ;;  %v3004_v0 = vld [vmem:[#allocation7 + $0x234] ss:$8 sps:$4 sm:$0xff]   ;;  %v3002_v1 = vld [vmem:[#allocation7 + $0x230] ss:$8 sps:$4 sm:$0xff]  }
 0x194   :  { %v3252_v22 = vpack.c.bf16 %v1524_v17, %v1518_v5  ;;  %v1529_v23 = vpack.c.bf16 %v1523_v19, %v1517_v18  ;;  %v3007_v2 = vld [vmem:[#allocation7 + $0x244] ss:$8 sps:$4 sm:$0xff]   ;;  %v3005_v3 = vld [vmem:[#allocation7 + $0x240] ss:$8 sps:$4 sm:$0xff]   ;;  %v3010_v4 = vld [vmem:[#allocation7 + $0x254] ss:$8 sps:$4 sm:$0xff]  }
 0x195   :  { %v1531_v9 = vpack.c.bf16 %v1525_v20, %v1519_v11  ;;  %v3008_v5 = vld [vmem:[#allocation7 + $0x250] ss:$8 sps:$4 sm:$0xff]   ;;  %v3013_v6 = vld [vmem:[#allocation7 + $0x264] ss:$8 sps:$4 sm:$0xff]   ;;  %v3011_v7 = vld [vmem:[#allocation7 + $0x260] ss:$8 sps:$4 sm:$0xff]  }
 0x196   :  { %2154 = vmatprep.mubr.bf16.mxu1 %v1529_v23  ;;  %v3016_v8 = vld [vmem:[#allocation7 + $0x274] ss:$8 sps:$4 sm:$0xff]   ;;  %v3014_v10 = vld [vmem:[#allocation7 + $0x270] ss:$8 sps:$4 sm:$0xff]   ;;  %v3019_v11 = vld [vmem:[#allocation7 + $0x284] ss:$8 sps:$4 sm:$0xff]  }
 0x197   :  { %2155 = vmatmul.mubr.bf16.vlgmr.msra.gmra.mrb[4].mxu1 %v1528_v21  ;;  %v3017_v12 = vld [vmem:[#allocation7 + $0x280] ss:$8 sps:$4 sm:$0xff]   ;;  %v3022_v13 = vld [vmem:[#allocation7 + $0x294] ss:$8 sps:$4 sm:$0xff]   ;;  %v3020_v15 = vld [vmem:[#allocation7 + $0x290] ss:$8 sps:$4 sm:$0xff]  }
 0x198   :  { %2166 = vmatpush1.bf16.msra.mxu1 %v2945_v24  ;;  %2197 = vmatprep.mubr.bf16.mxu1 %v1531_v9  ;;  %v3025_v16 = vld [vmem:[#allocation7 + $0x2a4] ss:$8 sps:$4 sm:$0xff]   ;;  %v3023_v17 = vld [vmem:[#allocation7 + $0x2a0] ss:$8 sps:$4 sm:$0xff]   ;;  %v3028_v18 = vld [vmem:[#allocation7 + $0x2b4] ss:$8 sps:$4 sm:$0xff]  }
 0x199   :  { %2167 = vmatprep.subr.bf16.mxu1 %v2950_v25  ;;  %v3026_v19 = vld [vmem:[#allocation7 + $0x2b0] ss:$8 sps:$4 sm:$0xff]   ;;  %v3031_v20 = vld [vmem:[#allocation7 + $0x2c4] ss:$8 sps:$4 sm:$0xff]   ;;  %v3029_v21 = vld [vmem:[#allocation7 + $0x2c0] ss:$8 sps:$4 sm:$0xff]  }
 0x19a   :  { %v286_v23 = vsub.s32 4, %v3233_v49  ;;  %v290_v9 = vsub.s32 5, %v3233_v49  ;;  %v3032_v24 = vld [vmem:[#allocation7 + $0x2d0] ss:$8 sps:$4 sm:$0xff]  }
 0x19c   :  { %2168 = vmatpush1.bf16.msra.mxu1 %v2948_v37  ;;  %v287_v25 = vrot.slane %v3240_v53, %v286_v23  ;;  %v3037_v37 = vld [vmem:[#allocation7 + $0x2e4] ss:$8 sps:$4 sm:$0xff]  }
 0x19d   :  { %2169 = vmatprep.subr.bf16.mxu1 %v2953_v26  ;;  %v291_v26 = vrot.slane %v3240_v53, %v290_v9 }
 0x1a0   :  { %2170 = vmatpush1.bf16.msra.mxu1 %v2951_v27 }
 0x1a1   :  { %2171 = vmatprep.subr.bf16.mxu1 %v2956_v28  ;;  %v3035_v28 = vld [vmem:[#allocation7 + $0x2e0] ss:$8 sps:$4 sm:$0xff]  }
 0x1a4   :  { %2172 = vmatpush1.bf16.msra.mxu1 %v2954_v29 }
 0x1a5   :  { %2173 = vmatprep.subr.bf16.mxu1 %v2959_v50 }
 0x1a8   :  { %2174 = vmatpush1.bf16.msra.mxu1 %v2957_v30  ;;  %v3040_v30 = vld [vmem:[#allocation7 + $0x2f4] ss:$8 sps:$4 sm:$0xff]  }
 0x1a9   :  { %2175 = vmatprep.subr.bf16.mxu1 %v2962_v31 }
 0x1ac   :  { %2176 = vmatpush1.bf16.msra.mxu1 %v2960_v32 }
 0x1ad   :  { %2177 = vmatprep.subr.bf16.mxu1 %v2965_v33 }
 0x1b0   :  { %2178 = vmatpush1.bf16.msra.mxu1 %v2963_v34 }
 0x1b1   :  { %2179 = vmatprep.subr.bf16.mxu1 %v2968_v35 }
 0x1b4   :  { %2180 = vmatpush1.bf16.msra.mxu1 %v2966_v36  ;;  %v3038_v36 = vld [vmem:[#allocation7 + $0x2f0] ss:$8 sps:$4 sm:$0xff]  }
 0x1b5   :  { %2181 = vmatprep.subr.bf16.mxu1 %v2971_v38 }
 0x1b8   :  { %2182 = vmatpush1.bf16.msra.mxu1 %v2969_v39 }
 0x1b9   :  { %2183 = vmatprep.subr.bf16.mxu1 %v2974_v40 }
 0x1bc   :  { %2184 = vmatpush1.bf16.msra.mxu1 %v2972_v41 }
 0x1bd   :  { %2185 = vmatprep.subr.bf16.mxu1 %v2977_v42 }
 0x1c0   :  { %2186 = vmatpush1.bf16.msra.mxu1 %v2975_v43  ;;  %v1630_v43 = vld [vmem:[%s3282_s4] sm:$0x3]  ;;  %s3107_s4 = scalar_lea.vmem %s2261_s11, 512 }
 0x1c1   :  { %2187 = vmatprep.subr.bf16.mxu1 %v2980_v44  ;;  %v1635_v44 = vrot.slane %v1630_v43, %v270_v51  ;;  %p3108_p10 = scmp.ne.s32.totalorder %s2261_s11, %s3107_s4  ;;  %p3113_p12 = scmp.lt.s32.totalorder %s3107_s4, %s3107_s4 }
 0x1c3   :  { %p3114_p13 = por %p3113_p12, %p3112_p11 }
 0x1c4   :  { %2188 = vmatpush1.bf16.msra.mxu1 %v2978_v45  ;;  %v1639_v45 = vrot.slane %v1630_v43, %v274_v54 }
 0x1c5   :  { %2189 = vmatprep.subr.bf16.mxu1 %v2983_v46  ;;  %p3115_p0 = pnand %p3114_p13, %p3108_p10 }
 0x1c8   :  { %2190 = vmatpush1.bf16.msra.mxu1 %v2981_v47 }
 0x1c9   :  { %2191 = vmatprep.subr.bf16.mxu1 %v2986_v48 }
 0x1cc   :  { %2192 = vmatpush1.bf16.msra.mxu1 %v2984_v52 }
 0x1cd   :  { %2193 = vmatprep.subr.bf16.mxu1 %v2989_v55 }
 0x1d0   :  { %2194 = vmatpush1.bf16.msra.mxu1 %v2987_v14 }
 0x1d1   :  { %2195 = vmatprep.subr.bf16.mxu1 %v2992_v56 }
 0x1d4   :  { %2196 = vmatpush1.bf16.msra.mxu1 %v2990_v57 }
 0x1d5   :  { %2208 = vmatprep.subr.bf16.mxu1 %v2995_v58 }
 0x1d7   :  { %2198 = vmatmul.mubr.bf16.vlgmr.msra.gmra.mrb[4].mxu1 %v3252_v22  ;;  %v3034_v22 = vld [vmem:[#allocation7 + $0x2d4] ss:$8 sps:$4 sm:$0xff]  }
 0x1d8   :  { %2209 = vmatpush1.bf16.msra.mxu1 %v2993_v59 }
 0x1d9   :  { %2210 = vmatprep.subr.bf16.mxu1 %v2998_v60 }
 0x1dc   :  { %2211 = vmatpush1.bf16.msra.mxu1 %v2996_v61 }
 0x1dd   :  { %2212 = vmatprep.subr.bf16.mxu1 %v3001_v62 }
 0x1e0   :  { %2213 = vmatpush1.bf16.msra.mxu1 %v2999_v63 }
 0x1e1   :  { %2214 = vmatprep.subr.bf16.mxu1 %v3004_v0 }
 0x1e4   :  { %2215 = vmatpush1.bf16.msra.mxu1 %v3002_v1 }
 0x1e5   :  { %2216 = vmatprep.subr.bf16.mxu1 %v3007_v2 }
 0x1e8   :  { %2217 = vmatpush1.bf16.msra.mxu1 %v3005_v3 }
 0x1e9   :  { %2218 = vmatprep.subr.bf16.mxu1 %v3010_v4 }
 0x1ec   :  { %2219 = vmatpush1.bf16.msra.mxu1 %v3008_v5 }
 0x1ed   :  { %2220 = vmatprep.subr.bf16.mxu1 %v3013_v6 }
 0x1f0   :  { %2221 = vmatpush1.bf16.msra.mxu1 %v3011_v7 }
 0x1f1   :  { %2222 = vmatprep.subr.bf16.mxu1 %v3016_v8 }
 0x1f4   :  { %2223 = vmatpush1.bf16.msra.mxu1 %v3014_v10 }
 0x1f5   :  { %2224 = vmatprep.subr.bf16.mxu1 %v3019_v11 }
 0x1f8   :  { %2225 = vmatpush1.bf16.msra.mxu1 %v3017_v12 }
 0x1f9   :  { %2226 = vmatprep.subr.bf16.mxu1 %v3022_v13 }
 0x1fc   :  { %2227 = vmatpush1.bf16.msra.mxu1 %v3020_v15 }
 0x1fd   :  { %2228 = vmatprep.subr.bf16.mxu1 %v3025_v16 }
 0x200   :  { %2229 = vmatpush1.bf16.msra.mxu1 %v3023_v17 }
 0x201   :  { %2230 = vmatprep.subr.bf16.mxu1 %v3028_v18 }
 0x204   :  { %2231 = vmatpush1.bf16.msra.mxu1 %v3026_v19 }
 0x205   :  { %2232 = vmatprep.subr.bf16.mxu1 %v3031_v20 }
 0x208   :  { %2233 = vmatpush1.bf16.msra.mxu1 %v3029_v21 }
 0x209   :  { %2234 = vmatprep.subr.bf16.mxu1 %v3034_v22 }
 0x20c   :  { %v1507_v27 = vpop.f32.mrb[4].mxu0  ;;  %2235 = vmatpush1.bf16.msra.mxu1 %v3032_v24 }
 0x20d   :  { %v2569_v29 = vadd.f32 %v1507_v27, %v287_v25  ;;  %v1509_v50 = vpop.f32.mrb[5].mxu0  ;;  %2236 = vmatprep.subr.bf16.mxu1 %v3037_v37 }
 0x20e   :  { %v2570_v31 = vadd.f32 %v1509_v50, %v291_v26  ;;  %v1511_v32 = vpop.f32.mrb[6].mxu0 }
 0x20f   :  { %v2571_v33 = vadd.f32 %v1511_v32, %v287_v25  ;;  %v1513_v34 = vpop.f32.mrb[7].mxu0  ;;  %v1520_v38 = vmax.f32 %v2569_v29, 0.0 }
 0x210   :  { %v2572_v35 = vadd.f32 %v1513_v34, %v291_v26  ;;  %2237 = vmatpush1.bf16.msra.mxu1 %v3035_v28  ;;  %v1521_v40 = vmax.f32 %v2570_v31, 0.0 }
 0x211   :  { %v1526_v39 = vmax.f32 %v2571_v33, 0.0  ;;  %2238 = vmatprep.subr.bf16.mxu1 %v3040_v30 }
 0x212   :  { %v1527_v41 = vmax.f32 %v2572_v35, 0.0 }
 0x213   :  { %v1532_v53 = vpack.c.bf16 %v1526_v39, %v1520_v38 }
 0x214   :  { %v1533_v42 = vpack.c.bf16 %v1527_v41, %v1521_v40  ;;  %2239 = vmatpush1.bf16.msra.mxu1 %v3038_v36 }
 0x216   :  { %2240 = vmatprep.mubr.bf16.mxu1 %v1533_v42 }
 0x217   :  { %2241 = vmatmul.mubr.bf16.vlgmr.msra.gmra.mrb[4].mxu1 %v1532_v53 }
 0x2ea   :  { %v2242_v46 = vpop.f32.mrb[4].mxu1 }
 0x2eb   :  { %v2573_v47 = vadd.f32 %v2242_v46, %v1635_v44  ;;  %v2244_v48 = vpop.f32.mrb[5].mxu1 }
 0x2ec   :  { %v2574_v52 = vadd.f32 %v2244_v48, %v1639_v45  ;;  %v2246_v55 = vpop.f32.mrb[6].mxu1 }
 0x2ed   :  { %2251 = vst [vmem:[#allocation8] sm:$0xff] %v2573_v47  ;;  %v2575_v14 = vadd.f32 %v2246_v55, %v1635_v44  ;;  %v2248_v56 = vpop.f32.mrb[7].mxu1 }
 0x2ee   :  { %2252 = vst [vmem:[#allocation8 + $0x8] sm:$0xff] %v2574_v52  ;;  %v2576_v57 = vadd.f32 %v2248_v56, %v1639_v45 }
 0x2ef   :  { %2253 = vst [vmem:[#allocation8 + $0x10] sm:$0xff] %v2575_v14 }
 0x2f0   :  { %2254 = vst [vmem:[#allocation8 + $0x18] sm:$0xff] %v2576_v57 }
 0x2f1   :  { %3118 = shalt.err (!%p3115_p0)
}
 0x2f2   :  { %s3119_s14 = scalar_lea.hbm %s3283_s5, 512 }
 0x2f3   :  { %p3120_p1 = scmp.ne.s32.totalorder %s3283_s5, %s3119_s14  ;;  %p3123_p2 = scmp.lt.u32.totalorder %s3119_s14, %s3283_s5 }
 0x2f5   :  { %p3125_p3 = pnand %p3123_p2, %p3120_p1 }
 0x2f7   :  { %3128 = shalt.err (!%p3125_p3)
}
 0x2f8   :  { %s3145_s18 = smov 256   ;;  %s3146_s19 = smov 16  }
 0x2f9   :  { %2266 = dma.vmem_to_hbm [thread:$0]  %s2261_s11, 512, %s3283_s5, [#allocation4], %s3145_s18, %s3145_s18, %s3146_s19  }
 0x2fa   :  { %3133 = dma.done.wait [#allocation4], 512  }
 0x2fb   :  { %3134 = vsyncadd [#allocation4], 4294966784 }
 0x2fc   :  { %2270 = vsyncpa [#allocation3], 1 }
 0x2fd   :  { %2271 = vsyncpa [#allocation6], 1 }
 0x2fe   :  { %2272 = vsyncpa [#allocation4], 1 }

// kernel: tpu_custom_call.1
= control target key start
LH: loop header
LB: loop body
LE: loop exit
PB: predicated region body
PF: predicated region fallthrough
CT: control target
= control target key end

     0   :  { %10 = vsyncpa [#allocation3], 0  ;;  %s3278_s0 = inlined_call_operand.hbm [shape: f32[16,512], index: 0, kind: input, shape index: {}]   ;;  %s3279_s1 = inlined_call_operand.hbm [shape: bf16[512,768], index: 1, kind: input, shape index: {}]   ;;  %s3280_s2 = inlined_call_operand.vmem [shape: f32[1,768], index: 2, kind: input, shape index: {}]   ;;  %s3281_s3 = inlined_call_operand.hbm [shape: bf16[768,256], index: 3, kind: input, shape index: {}]   ;;  %s3282_s4 = inlined_call_operand.vmem [shape: f32[1,256], index: 4, kind: input, shape index: {}]   ;;  %s3283_s5 = inlined_call_operand.hbm [shape: f32[16,256], index: 5, kind: output, shape index: {}]  }
   0x1   :  { %11 = vsyncpa [#allocation6], 0 }
   0x2   :  { %12 = vsyncpa [#allocation4], 0  ;;  %s3135_s18 = smov [#allocation5]   ;;  %s3041_s22 = scalar_lea.hbm %s3279_s1, 24576 }
   0x3   :  { %s30_s19 = sshll.u32 %s3135_s18, 4  ;;  %p3042_p0 = scmp.ne.s32.totalorder %s3279_s1, %s3041_s22  ;;  %s31_s19 = int_to_ptr.vmem [resolvable:$true] %s30_s19 }
   0x4   :  { %p3045_p1 = scmp.lt.u32.totalorder %s3041_s22, %s3279_s1 }
   0x6   :  { %p3047_p2 = pnand %p3045_p1, %p3042_p0 }
   0x8   :  { %3050 = shalt.err (!%p3047_p2)
}
   0x9   :  { %s3051_s27 = scalar_lea.vmem %s31_s19, 24576  ;;  %p3056_p4 = scmp.lt.s32.totalorder %s31_s19, %s31_s19 }
   0xa   :  { %p3052_p3 = scmp.ne.s32.totalorder %s31_s19, %s3051_s27  ;;  %p3057_p5 = scmp.lt.s32.totalorder %s3051_s27, %s3051_s27 }
   0xc   :  { %p3058_p6 = por %p3057_p5, %p3056_p4 }
   0xe   :  { %p3059_p7 = pnand %p3058_p6, %p3052_p3 }
  0x10   :  { %3062 = shalt.err (!%p3059_p7)
}
  0x11   :  { %s3136_s28 = smov 384   ;;  %s3137_s29 = smov 24  }
  0x12   :  { %36 = dma.hbm_to_vmem [thread:$0]  %s3279_s1, 24576, %s31_s19, [#allocation6], %s3136_s28, %s3136_s28, %s3137_s29  }
  0x13   :  { %s3138_s7 = smov [#allocation2]   ;;  %s3063_s11 = scalar_lea.hbm %s3278_s0, 1024 }
  0x14   :  { %s18_s8 = sshll.u32 %s3138_s7, 4  ;;  %p3064_p8 = scmp.ne.s32.totalorder %s3278_s0, %s3063_s11  ;;  %s19_s8 = int_to_ptr.vmem [resolvable:$true] %s18_s8 }
  0x15   :  { %p3067_p9 = scmp.lt.u32.totalorder %s3063_s11, %s3278_s0 }
  0x17   :  { %p3069_p10 = pnand %p3067_p9, %p3064_p8 }
  0x19   :  { %3072 = shalt.err (!%p3069_p10)
}
  0x1a   :  { %s3073_s16 = scalar_lea.vmem %s19_s8, 1024  ;;  %p3078_p12 = scmp.lt.s32.totalorder %s19_s8, %s19_s8 }
  0x1b   :  { %p3074_p11 = scmp.ne.s32.totalorder %s19_s8, %s3073_s16  ;;  %p3079_p13 = scmp.lt.s32.totalorder %s3073_s16, %s3073_s16 }
  0x1d   :  { %p3080_p0 = por %p3079_p13, %p3078_p12 }
  0x1f   :  { %p3081_p1 = pnand %p3080_p0, %p3074_p11 }
  0x21   :  { %3084 = shalt.err (!%p3081_p1)
}
  0x22   :  { %s3139_s1 = smov 512   ;;  %s3140_s17 = smov 32  }
  0x23   :  { %24 = dma.hbm_to_vmem [thread:$0]  %s3278_s0, 1024, %s19_s8, [#allocation3], %s3139_s1, %s3139_s1, %s3140_s17  }
  0x24   :  { %s3141_s20 = smov [#allocation7]   ;;  %s3085_s24 = scalar_lea.hbm %s3281_s3, 12288 }
  0x25   :  { %s44_s21 = sshll.u32 %s3141_s20, 4  ;;  %p3086_p2 = scmp.ne.s32.totalorder %s3281_s3, %s3085_s24  ;;  %s45_s21 = int_to_ptr.vmem [resolvable:$true] %s44_s21 }
  0x26   :  { %p3089_p3 = scmp.lt.u32.totalorder %s3085_s24, %s3281_s3 }
  0x28   :  { %p3091_p4 = pnand %p3089_p3, %p3086_p2 }
  0x2a   :  { %3094 = shalt.err (!%p3091_p4)
}
  0x2b   :  { %s3095_s29 = scalar_lea.vmem %s45_s21, 12288  ;;  %p3100_p6 = scmp.lt.s32.totalorder %s45_s21, %s45_s21 }
  0x2c   :  { %p3096_p5 = scmp.ne.s32.totalorder %s45_s21, %s3095_s29  ;;  %p3101_p7 = scmp.lt.s32.totalorder %s3095_s29, %s3095_s29 }
  0x2e   :  { %p3102_p8 = por %p3101_p7, %p3100_p6 }
  0x30   :  { %p3103_p9 = pnand %p3102_p8, %p3096_p5 }
  0x32   :  { %3106 = shalt.err (!%p3103_p9)
}
  0x33   :  { %s3142_s0 = smov 128   ;;  %s3143_s30 = smov 8  }
  0x34   :  { %50 = dma.hbm_to_vmem [thread:$0]  %s3281_s3, 12288, %s45_s21, [#allocation6], %s3142_s0, %s3142_s0, %s3143_s30  }
  0x35   :  { %3129 = dma.done.wait [#allocation3], 1024  }
  0x36   :  { %3130 = vsyncadd [#allocation3], 4294966272 }
  0x37   :  { %3131 = dma.done.wait [#allocation6], 36864  }
  0x38   :  { %3132 = vsyncadd [#allocation6], 4294930432  ;;  %v2609_v0 = vld [vmem:[#allocation5 + $0x4] ss:$24 sps:$4 sm:$0xff]   ;;  %v2613_v2 = vld [vmem:[#allocation5] ss:$24 sps:$4 sm:$0xff]  }
  0x39   :  { %v2611_v1 = vld [vmem:[#allocation5 + $0xc] ss:$24 sps:$4 sm:$0xff]   ;;  %1258 = vmatprep.subr.bf16.mxu0 %v2609_v0  ;;  %v2614_v3 = vld [vmem:[#allocation5 + $0x8] ss:$24 sps:$4 sm:$0xff]   ;;  %v2617_v5 = vld [vmem:[#allocation5 + $0x3c] ss:$24 sps:$4 sm:$0xff]  }
  0x3a   :  { %1344 = vmatprep.subr.bf16.mxu1 %v2611_v1  ;;  %v2615_v4 = vld [vmem:[#allocation5 + $0x34] ss:$24 sps:$4 sm:$0xff]   ;;  %1259 = vmatpush1.bf16.msra.mxu0 %v2613_v2  ;;  %v2619_v6 = vld [vmem:[#allocation5 + $0x30] ss:$24 sps:$4 sm:$0xff]   ;;  %v2621_v8 = vld [vmem:[#allocation5 + $0x64] ss:$24 sps:$4 sm:$0xff]  }
  0x3b   :  { %1345 = vmatpush1.bf16.msra.mxu1 %v2614_v3  ;;  %1260 = vmatprep.subr.bf16.mxu0 %v2615_v4  ;;  %v2620_v7 = vld [vmem:[#allocation5 + $0x38] ss:$24 sps:$4 sm:$0xff]   ;;  %v2623_v9 = vld [vmem:[#allocation5 + $0x6c] ss:$24 sps:$4 sm:$0xff]   ;;  %v2626_v11 = vld [vmem:[#allocation5 + $0x68] ss:$24 sps:$4 sm:$0xff]  }
  0x3c   :  { %1346 = vmatprep.subr.bf16.mxu1 %v2617_v5  ;;  %v2625_v10 = vld [vmem:[#allocation5 + $0x60] ss:$24 sps:$4 sm:$0xff]   ;;  %v2627_v12 = vld [vmem:[#allocation5 + $0x94] ss:$24 sps:$4 sm:$0xff]   ;;  %v2631_v14 = vld [vmem:[#allocation5 + $0x90] ss:$24 sps:$4 sm:$0xff]  }
  0x3d   :  { %v2629_v13 = vld [vmem:[#allocation5 + $0x9c] ss:$24 sps:$4 sm:$0xff]   ;;  %v2632_v15 = vld [vmem:[#allocation5 + $0x98] ss:$24 sps:$4 sm:$0xff]   ;;  %v2635_v17 = vld [vmem:[#allocation5 + $0xcc] ss:$24 sps:$4 sm:$0xff]  }
  0x3e   :  { %1261 = vmatpush1.bf16.msra.mxu0 %v2619_v6  ;;  %v2633_v16 = vld [vmem:[#allocation5 + $0xc4] ss:$24 sps:$4 sm:$0xff]   ;;  %v2637_v18 = vld [vmem:[#allocation5 + $0xc0] ss:$24 sps:$4 sm:$0xff]   ;;  %v2639_v20 = vld [vmem:[#allocation5 + $0xf4] ss:$24 sps:$4 sm:$0xff]  }
  0x3f   :  { %1347 = vmatpush1.bf16.msra.mxu1 %v2620_v7  ;;  %1262 = vmatprep.subr.bf16.mxu0 %v2621_v8  ;;  %v2638_v19 = vld [vmem:[#allocation5 + $0xc8] ss:$24 sps:$4 sm:$0xff]   ;;  %v2641_v21 = vld [vmem:[#allocation5 + $0xfc] ss:$24 sps:$4 sm:$0xff]   ;;  %v2644_v23 = vld [vmem:[#allocation5 + $0xf8] ss:$24 sps:$4 sm:$0xff]  }
  0x40   :  { %1348 = vmatprep.subr.bf16.mxu1 %v2623_v9  ;;  %v2643_v22 = vld [vmem:[#allocation5 + $0xf0] ss:$24 sps:$4 sm:$0xff]   ;;  %v2645_v24 = vld [vmem:[#allocation5 + $0x124] ss:$24 sps:$4 sm:$0xff]   ;;  %v2649_v26 = vld [vmem:[#allocation5 + $0x120] ss:$24 sps:$4 sm:$0xff]  }
  0x41   :  { %v2647_v25 = vld [vmem:[#allocation5 + $0x12c] ss:$24 sps:$4 sm:$0xff]   ;;  %v2650_v27 = vld [vmem:[#allocation5 + $0x128] ss:$24 sps:$4 sm:$0xff]   ;;  %v2653_v29 = vld [vmem:[#allocation5 + $0x15c] ss:$24 sps:$4 sm:$0xff]  }
  0x42   :  { %1263 = vmatpush1.bf16.msra.mxu0 %v2625_v10  ;;  %v2651_v28 = vld [vmem:[#allocation5 + $0x154] ss:$24 sps:$4 sm:$0xff]   ;;  %v2655_v30 = vld [vmem:[#allocation5 + $0x150] ss:$24 sps:$4 sm:$0xff]   ;;  %v2657_v32 = vld [vmem:[#allocation5 + $0x184] ss:$24 sps:$4 sm:$0xff]  }
  0x43   :  { %1349 = vmatpush1.bf16.msra.mxu1 %v2626_v11  ;;  %1264 = vmatprep.subr.bf16.mxu0 %v2627_v12  ;;  %v2656_v31 = vld [vmem:[#allocation5 + $0x158] ss:$24 sps:$4 sm:$0xff]   ;;  %v2659_v33 = vld [vmem:[#allocation5 + $0x18c] ss:$24 sps:$4 sm:$0xff]   ;;  %v2662_v35 = vld [vmem:[#allocation5 + $0x188] ss:$24 sps:$4 sm:$0xff]  }
  0x44   :  { %1350 = vmatprep.subr.bf16.mxu1 %v2629_v13  ;;  %v2661_v34 = vld [vmem:[#allocation5 + $0x180] ss:$24 sps:$4 sm:$0xff]   ;;  %v2663_v36 = vld [vmem:[#allocation5 + $0x1b4] ss:$24 sps:$4 sm:$0xff]   ;;  %v2667_v38 = vld [vmem:[#allocation5 + $0x1b0] ss:$24 sps:$4 sm:$0xff]  }
  0x45   :  { %v2665_v37 = vld [vmem:[#allocation5 + $0x1bc] ss:$24 sps:$4 sm:$0xff]   ;;  %v2668_v39 = vld [vmem:[#allocation5 + $0x1b8] ss:$24 sps:$4 sm:$0xff]   ;;  %v2671_v41 = vld [vmem:[#allocation5 + $0x1ec] ss:$24 sps:$4 sm:$0xff]  }
  0x46   :  { %1265 = vmatpush1.bf16.msra.mxu0 %v2631_v14  ;;  %v2669_v40 = vld [vmem:[#allocation5 + $0x1e4] ss:$24 sps:$4 sm:$0xff]   ;;  %v2673_v42 = vld [vmem:[#allocation5 + $0x1e0] ss:$24 sps:$4 sm:$0xff]   ;;  %v2675_v44 = vld [vmem:[#allocation5 + $0x214] ss:$24 sps:$4 sm:$0xff]  }
  0x47   :  { %1351 = vmatpush1.bf16.msra.mxu1 %v2632_v15  ;;  %1266 = vmatprep.subr.bf16.mxu0 %v2633_v16  ;;  %v2674_v43 = vld [vmem:[#allocation5 + $0x1e8] ss:$24 sps:$4 sm:$0xff]   ;;  %v2677_v45 = vld [vmem:[#allocation5 + $0x21c] ss:$24 sps:$4 sm:$0xff]   ;;  %v2680_v49 = vld [vmem:[#allocation5 + $0x218] ss:$24 sps:$4 sm:$0xff]  }
  0x48   :  { %1352 = vmatprep.subr.bf16.mxu1 %v2635_v17  ;;  %v63_v46 = vld [vmem:[#allocation2 + $0x8] sm:$0xff]  ;;  %v2681_v51 = vld [vmem:[#allocation5 + $0x244] ss:$24 sps:$4 sm:$0xff]   ;;  %v2685_v53 = vld [vmem:[#allocation5 + $0x240] ss:$24 sps:$4 sm:$0xff]   ;;  %s3144_s10 = smov [#allocation8]  }
  0x49   :  { %v67_v47 = vld [vmem:[#allocation2 + $0x28] sm:$0xff]  ;;  %v2689_v56 = vld [vmem:[#allocation5 + $0x27c] ss:$24 sps:$4 sm:$0xff]   ;;  %v2692_v58 = vld [vmem:[#allocation5 + $0x278] ss:$24 sps:$4 sm:$0xff]   ;;  %s2260_s11 = sshll.u32 %s3144_s10, 4  ;;  %s2261_s11 = int_to_ptr.vmem [resolvable:$true] %s2260_s11 }
  0x4a   :  { %1267 = vmatpush1.bf16.msra.mxu0 %v2637_v18  ;;  %v2679_v48 = vld [vmem:[#allocation5 + $0x210] ss:$24 sps:$4 sm:$0xff]   ;;  %v3213_v50 = vpack.c.bf16 %v67_v47, %v63_v46  ;;  %v2683_v52 = vld [vmem:[#allocation5 + $0x24c] ss:$24 sps:$4 sm:$0xff]   ;;  %v2697_v61 = vld [vmem:[#allocation5 + $0x2a0] ss:$24 sps:$4 sm:$0xff]   ;;  %p3112_p11 = scmp.lt.s32.totalorder %s2261_s11, %s2261_s11 }
  0x4b   :  { %1353 = vmatpush1.bf16.msra.mxu1 %v2638_v19  ;;  %1268 = vmatprep.subr.bf16.mxu0 %v2639_v20  ;;  %v2686_v54 = vld [vmem:[#allocation5 + $0x248] ss:$24 sps:$4 sm:$0xff]   ;;  %v2687_v55 = vld [vmem:[#allocation5 + $0x274] ss:$24 sps:$4 sm:$0xff]   ;;  %v2693_v59 = vld [vmem:[#allocation5 + $0x2a4] ss:$24 sps:$4 sm:$0xff]  }
  0x4c   :  { %1354 = vmatprep.subr.bf16.mxu1 %v2641_v21  ;;  %1290 = vmatprep.mubr.bf16.mxu0 %v3213_v50  ;;  %v2691_v57 = vld [vmem:[#allocation5 + $0x270] ss:$24 sps:$4 sm:$0xff]   ;;  %v2695_v60 = vld [vmem:[#allocation5 + $0x2ac] ss:$24 sps:$4 sm:$0xff]   ;;  %v2701_v0 = vld [vmem:[#allocation5 + $0x2dc] ss:$24 sps:$4 sm:$0xff]  }
  0x4d   :  { %1376 = vmatprep.mubr.bf16.mxu1 %v3213_v50  ;;  %v2698_v62 = vld [vmem:[#allocation5 + $0x2a8] ss:$24 sps:$4 sm:$0xff]   ;;  %v2699_v63 = vld [vmem:[#allocation5 + $0x2d4] ss:$24 sps:$4 sm:$0xff]   ;;  %v2704_v2 = vld [vmem:[#allocation5 + $0x2d8] ss:$24 sps:$4 sm:$0xff]  }
  0x4e   :  { %1269 = vmatpush1.bf16.msra.mxu0 %v2643_v22  ;;  %v2703_v1 = vld [vmem:[#allocation5 + $0x2d0] ss:$24 sps:$4 sm:$0xff]   ;;  %v2707_v3 = vld [vmem:[#allocation5 + $0x304] ss:$24 sps:$4 sm:$0xff]   ;;  %v2705_v7 = vld [vmem:[#allocation5 + $0x300] ss:$24 sps:$4 sm:$0xff]  }
  0x4f   :  { %1355 = vmatpush1.bf16.msra.mxu1 %v2644_v23  ;;  %1270 = vmatprep.subr.bf16.mxu0 %v2645_v24  ;;  %v62_v4 = vld [vmem:[#allocation2] sm:$0xff]  ;;  %v2713_v10 = vld [vmem:[#allocation5 + $0x334] ss:$24 sps:$4 sm:$0xff]   ;;  %v2711_v12 = vld [vmem:[#allocation5 + $0x330] ss:$24 sps:$4 sm:$0xff]  }
  0x50   :  { %1356 = vmatprep.subr.bf16.mxu1 %v2647_v25  ;;  %v66_v5 = vld [vmem:[#allocation2 + $0x20] sm:$0xff]  ;;  %v2716_v11 = vld [vmem:[#allocation5 + $0x33c] ss:$24 sps:$4 sm:$0xff]   ;;  %v2714_v13 = vld [vmem:[#allocation5 + $0x338] ss:$24 sps:$4 sm:$0xff]  }
  0x51   :  { %v2710_v6 = vld [vmem:[#allocation5 + $0x30c] ss:$24 sps:$4 sm:$0xff]   ;;  %v2708_v8 = vld [vmem:[#allocation5 + $0x308] ss:$24 sps:$4 sm:$0xff]   ;;  %v3217_v9 = vpack.c.bf16 %v66_v5, %v62_v4  ;;  %v2728_v19 = vld [vmem:[#allocation5 + $0x39c] ss:$24 sps:$4 sm:$0xff]  }
  0x52   :  { %1271 = vmatpush1.bf16.msra.mxu0 %v2649_v26  ;;  %v2719_v14 = vld [vmem:[#allocation5 + $0x364] ss:$24 sps:$4 sm:$0xff]   ;;  %v2717_v16 = vld [vmem:[#allocation5 + $0x360] ss:$24 sps:$4 sm:$0xff]   ;;  %v2725_v18 = vld [vmem:[#allocation5 + $0x394] ss:$24 sps:$4 sm:$0xff]  }
  0x53   :  { %1357 = vmatpush1.bf16.msra.mxu1 %v2650_v27  ;;  %1272 = vmatprep.subr.bf16.mxu0 %v2651_v28  ;;  %v2722_v15 = vld [vmem:[#allocation5 + $0x36c] ss:$24 sps:$4 sm:$0xff]   ;;  %v2720_v17 = vld [vmem:[#allocation5 + $0x368] ss:$24 sps:$4 sm:$0xff]   ;;  %v2726_v21 = vld [vmem:[#allocation5 + $0x398] ss:$24 sps:$4 sm:$0xff]  }
  0x54   :  { %1358 = vmatprep.subr.bf16.mxu1 %v2653_v29  ;;  %v2723_v20 = vld [vmem:[#allocation5 + $0x390] ss:$24 sps:$4 sm:$0xff]   ;;  %v2731_v22 = vld [vmem:[#allocation5 + $0x3c4] ss:$24 sps:$4 sm:$0xff]   ;;  %v2729_v24 = vld [vmem:[#allocation5 + $0x3c0] ss:$24 sps:$4 sm:$0xff]  }
  0x55   :  { %v2734_v23 = vld [vmem:[#allocation5 + $0x3cc] ss:$24 sps:$4 sm:$0xff]   ;;  %v2732_v25 = vld [vmem:[#allocation5 + $0x3c8] ss:$24 sps:$4 sm:$0xff]   ;;  %v2740_v27 = vld [vmem:[#allocation5 + $0x3fc] ss:$24 sps:$4 sm:$0xff]  }
  0x56   :  { %1273 = vmatpush1.bf16.msra.mxu0 %v2655_v30  ;;  %v2737_v26 = vld [vmem:[#allocation5 + $0x3f4] ss:$24 sps:$4 sm:$0xff]   ;;  %v2735_v28 = vld [vmem:[#allocation5 + $0x3f0] ss:$24 sps:$4 sm:$0xff]   ;;  %v2743_v30 = vld [vmem:[#allocation5 + $0x424] ss:$24 sps:$4 sm:$0xff]  }
  0x57   :  { %1359 = vmatpush1.bf16.msra.mxu1 %v2656_v31  ;;  %1274 = vmatprep.subr.bf16.mxu0 %v2657_v32  ;;  %v2738_v29 = vld [vmem:[#allocation5 + $0x3f8] ss:$24 sps:$4 sm:$0xff]   ;;  %v2746_v31 = vld [vmem:[#allocation5 + $0x42c] ss:$24 sps:$4 sm:$0xff]   ;;  %v2764_v46 = vld [vmem:[#allocation5 + $0x4bc] ss:$24 sps:$4 sm:$0xff]  }
  0x58   :  { %1360 = vmatprep.subr.bf16.mxu1 %v2659_v33  ;;  %v65_v32 = vld [vmem:[#allocation2 + $0x18] sm:$0xff]  ;;  %v2759_v47 = vld [vmem:[#allocation5 + $0x4b0] ss:$24 sps:$4 sm:$0xff]  }
  0x59   :  { %v2741_v33 = vld [vmem:[#allocation5 + $0x420] ss:$24 sps:$4 sm:$0xff]  }
  0x5a   :  { %1275 = vmatpush1.bf16.msra.mxu0 %v2661_v34  ;;  %v2744_v34 = vld [vmem:[#allocation5 + $0x428] ss:$24 sps:$4 sm:$0xff]  }
  0x5b   :  { %1361 = vmatpush1.bf16.msra.mxu1 %v2662_v35  ;;  %1276 = vmatprep.subr.bf16.mxu0 %v2663_v36  ;;  %v69_v35 = vld [vmem:[#allocation2 + $0x38] sm:$0xff]  ;;  %v2749_v36 = vld [vmem:[#allocation5 + $0x454] ss:$24 sps:$4 sm:$0xff]   ;;  %v2792_v5 = vld [vmem:[#allocation5 + $0x5a8] ss:$24 sps:$4 sm:$0xff]  }
  0x5c   :  { %1362 = vmatprep.subr.bf16.mxu1 %v2665_v37  ;;  %v3221_v37 = vpack.c.bf16 %v69_v35, %v65_v32  ;;  %v2789_v4 = vld [vmem:[#allocation5 + $0x5a0] ss:$24 sps:$4 sm:$0xff]   ;;  %v2818_v32 = vld [vmem:[#allocation5 + $0x104] ss:$24 sps:$4 sm:$0xff]  }
  0x5d   :  { %v2914_v35 = vld [vmem:[#allocation7 + $0x54] ss:$8 sps:$4 sm:$0xff]  }
  0x5e   :  { %1277 = vmatpush1.bf16.msra.mxu0 %v2667_v38  ;;  %v2752_v38 = vld [vmem:[#allocation5 + $0x45c] ss:$24 sps:$4 sm:$0xff]  }
  0x5f   :  { %1363 = vmatpush1.bf16.msra.mxu1 %v2668_v39  ;;  %1278 = vmatprep.subr.bf16.mxu0 %v2669_v40  ;;  %v2747_v39 = vld [vmem:[#allocation5 + $0x450] ss:$24 sps:$4 sm:$0xff]  }
  0x60   :  { %1364 = vmatprep.subr.bf16.mxu1 %v2671_v41  ;;  %v2750_v40 = vld [vmem:[#allocation5 + $0x458] ss:$24 sps:$4 sm:$0xff]   ;;  %v2755_v41 = vld [vmem:[#allocation5 + $0x484] ss:$24 sps:$4 sm:$0xff]  }
  0x62   :  { %1279 = vmatpush1.bf16.msra.mxu0 %v2673_v42  ;;  %v2758_v42 = vld [vmem:[#allocation5 + $0x48c] ss:$24 sps:$4 sm:$0xff]  }
  0x63   :  { %1365 = vmatpush1.bf16.msra.mxu1 %v2674_v43  ;;  %1280 = vmatprep.subr.bf16.mxu0 %v2675_v44  ;;  %v2753_v43 = vld [vmem:[#allocation5 + $0x480] ss:$24 sps:$4 sm:$0xff]  }
  0x64   :  { %1366 = vmatprep.subr.bf16.mxu1 %v2677_v45  ;;  %v2756_v44 = vld [vmem:[#allocation5 + $0x488] ss:$24 sps:$4 sm:$0xff]   ;;  %v2761_v45 = vld [vmem:[#allocation5 + $0x4b4] ss:$24 sps:$4 sm:$0xff]  }
  0x66   :  { %1281 = vmatpush1.bf16.msra.mxu0 %v2679_v48  ;;  %v2762_v48 = vld [vmem:[#allocation5 + $0x4b8] ss:$24 sps:$4 sm:$0xff]  }
  0x67   :  { %1367 = vmatpush1.bf16.msra.mxu1 %v2680_v49  ;;  %1282 = vmatprep.subr.bf16.mxu0 %v2681_v51  ;;  %v2767_v49 = vld [vmem:[#allocation5 + $0x4e4] ss:$24 sps:$4 sm:$0xff]  }
  0x68   :  { %1368 = vmatprep.subr.bf16.mxu1 %v2683_v52  ;;  %v2770_v51 = vld [vmem:[#allocation5 + $0x4ec] ss:$24 sps:$4 sm:$0xff]   ;;  %v2765_v52 = vld [vmem:[#allocation5 + $0x4e0] ss:$24 sps:$4 sm:$0xff]  }
  0x6a   :  { %1283 = vmatpush1.bf16.msra.mxu0 %v2685_v53  ;;  %v2768_v53 = vld [vmem:[#allocation5 + $0x4e8] ss:$24 sps:$4 sm:$0xff]  }
  0x6b   :  { %1369 = vmatpush1.bf16.msra.mxu1 %v2686_v54  ;;  %1284 = vmatprep.subr.bf16.mxu0 %v2687_v55  ;;  %v2773_v54 = vld [vmem:[#allocation5 + $0x514] ss:$24 sps:$4 sm:$0xff]  }
  0x6c   :  { %1370 = vmatprep.subr.bf16.mxu1 %v2689_v56  ;;  %v2776_v55 = vld [vmem:[#allocation5 + $0x51c] ss:$24 sps:$4 sm:$0xff]   ;;  %v2771_v56 = vld [vmem:[#allocation5 + $0x510] ss:$24 sps:$4 sm:$0xff]  }
  0x6e   :  { %1285 = vmatpush1.bf16.msra.mxu0 %v2691_v57  ;;  %v2774_v57 = vld [vmem:[#allocation5 + $0x518] ss:$24 sps:$4 sm:$0xff]  }
  0x6f   :  { %1371 = vmatpush1.bf16.msra.mxu1 %v2692_v58  ;;  %1286 = vmatprep.subr.bf16.mxu0 %v2693_v59  ;;  %v2779_v58 = vld [vmem:[#allocation5 + $0x544] ss:$24 sps:$4 sm:$0xff]  }
  0x70   :  { %1372 = vmatprep.subr.bf16.mxu1 %v2695_v60  ;;  %v2782_v59 = vld [vmem:[#allocation5 + $0x54c] ss:$24 sps:$4 sm:$0xff]   ;;  %v2777_v60 = vld [vmem:[#allocation5 + $0x540] ss:$24 sps:$4 sm:$0xff]  }
  0x72   :  { %1287 = vmatpush1.bf16.msra.mxu0 %v2697_v61  ;;  %v2780_v61 = vld [vmem:[#allocation5 + $0x548] ss:$24 sps:$4 sm:$0xff]  }
  0x73   :  { %1373 = vmatpush1.bf16.msra.mxu1 %v2698_v62  ;;  %1288 = vmatprep.subr.bf16.mxu0 %v2699_v63  ;;  %v2785_v62 = vld [vmem:[#allocation5 + $0x574] ss:$24 sps:$4 sm:$0xff]  }
  0x74   :  { %1374 = vmatprep.subr.bf16.mxu1 %v2701_v0  ;;  %v2788_v63 = vld [vmem:[#allocation5 + $0x57c] ss:$24 sps:$4 sm:$0xff]   ;;  %v2783_v0 = vld [vmem:[#allocation5 + $0x570] ss:$24 sps:$4 sm:$0xff]  }
  0x76   :  { %1289 = vmatpush1.bf16.msra.mxu0 %v2703_v1  ;;  %v2786_v1 = vld [vmem:[#allocation5 + $0x578] ss:$24 sps:$4 sm:$0xff]  }
  0x77   :  { %1375 = vmatpush1.bf16.msra.mxu1 %v2704_v2  ;;  %1301 = vmatprep.subr.bf16.mxu0 %v2707_v3  ;;  %v2791_v2 = vld [vmem:[#allocation5 + $0x5a4] ss:$24 sps:$4 sm:$0xff]  }
  0x78   :  { %1387 = vmatprep.subr.bf16.mxu1 %v2710_v6  ;;  %v2794_v3 = vld [vmem:[#allocation5 + $0x5ac] ss:$24 sps:$4 sm:$0xff]  }
  0x79   :  { %1291 = vmatmul.mubr.bf16.vlgmr.msra.gmra.mrb[0].mxu0 %v3217_v9  ;;  %v2797_v6 = vld [vmem:[#allocation5 + $0x5d4] ss:$24 sps:$4 sm:$0xff]  }
  0x7a   :  { %1377 = vmatmul.mubr.bf16.vlgmr.msra.gmra.mrb[0].mxu1 %v3217_v9  ;;  %1302 = vmatpush1.bf16.msra.mxu0 %v2705_v7  ;;  %v2800_v7 = vld [vmem:[#allocation5 + $0x5dc] ss:$24 sps:$4 sm:$0xff]  }
  0x7b   :  { %1388 = vmatpush1.bf16.msra.mxu1 %v2708_v8  ;;  %1303 = vmatprep.subr.bf16.mxu0 %v2713_v10  ;;  %v2795_v8 = vld [vmem:[#allocation5 + $0x5d0] ss:$24 sps:$4 sm:$0xff]  }
  0x7c   :  { %1389 = vmatprep.subr.bf16.mxu1 %v2716_v11  ;;  %1333 = vmatprep.mubr.bf16.mxu0 %v3221_v37  ;;  %v2798_v10 = vld [vmem:[#allocation5 + $0x5d8] ss:$24 sps:$4 sm:$0xff]  }
  0x7d   :  { %1419 = vmatprep.mubr.bf16.mxu1 %v3221_v37  ;;  %v64_v11 = vld [vmem:[#allocation2 + $0x10] sm:$0xff] }
  0x7e   :  { %1304 = vmatpush1.bf16.msra.mxu0 %v2711_v12  ;;  %v68_v12 = vld [vmem:[#allocation2 + $0x30] sm:$0xff] }
  0x7f   :  { %1390 = vmatpush1.bf16.msra.mxu1 %v2714_v13  ;;  %1305 = vmatprep.subr.bf16.mxu0 %v2719_v14  ;;  %v2803_v13 = vld [vmem:[#allocation5 + $0x14] ss:$24 sps:$4 sm:$0xff]   ;;  %v3225_v14 = vpack.c.bf16 %v68_v12, %v64_v11  ;;  %v2846_v11 = vld [vmem:[#allocation5 + $0x2e0] ss:$24 sps:$4 sm:$0xff]  }
  0x80   :  { %1391 = vmatprep.subr.bf16.mxu1 %v2722_v15  ;;  %v2801_v15 = vld [vmem:[#allocation5 + $0x10] ss:$24 sps:$4 sm:$0xff]   ;;  %v2851_v12 = vld [vmem:[#allocation5 + $0x314] ss:$24 sps:$4 sm:$0xff]  }
  0x82   :  { %1306 = vmatpush1.bf16.msra.mxu0 %v2717_v16  ;;  %v2806_v16 = vld [vmem:[#allocation5 + $0x44] ss:$24 sps:$4 sm:$0xff]  }
  0x83   :  { %1392 = vmatpush1.bf16.msra.mxu1 %v2720_v17  ;;  %1307 = vmatprep.subr.bf16.mxu0 %v2725_v18  ;;  %v2804_v17 = vld [vmem:[#allocation5 + $0x40] ss:$24 sps:$4 sm:$0xff]  }
  0x84   :  { %1393 = vmatprep.subr.bf16.mxu1 %v2728_v19  ;;  %v2897_v18 = vld [vmem:[#allocation7] ss:$8 sps:$4 sm:$0xff]   ;;  %v2899_v19 = vld [vmem:[#allocation7 + $0x4] ss:$8 sps:$4 sm:$0xff]  }
  0x86   :  { %1308 = vmatpush1.bf16.msra.mxu0 %v2723_v20  ;;  %v2809_v20 = vld [vmem:[#allocation5 + $0x74] ss:$24 sps:$4 sm:$0xff]  }
  0x87   :  { %1394 = vmatpush1.bf16.msra.mxu1 %v2726_v21  ;;  %1309 = vmatprep.subr.bf16.mxu0 %v2731_v22  ;;  %v2902_v21 = vld [vmem:[#allocation7 + $0x14] ss:$8 sps:$4 sm:$0xff]   ;;  %v2900_v22 = vld [vmem:[#allocation7 + $0x10] ss:$8 sps:$4 sm:$0xff]  }
  0x88   :  { %1395 = vmatprep.subr.bf16.mxu1 %v2734_v23  ;;  %v2905_v23 = vld [vmem:[#allocation7 + $0x24] ss:$8 sps:$4 sm:$0xff]  }
  0x8a   :  { %1310 = vmatpush1.bf16.msra.mxu0 %v2729_v24  ;;  %v2807_v24 = vld [vmem:[#allocation5 + $0x70] ss:$24 sps:$4 sm:$0xff]  }
  0x8b   :  { %1396 = vmatpush1.bf16.msra.mxu1 %v2732_v25  ;;  %1311 = vmatprep.subr.bf16.mxu0 %v2737_v26  ;;  %v2812_v25 = vld [vmem:[#allocation5 + $0xa4] ss:$24 sps:$4 sm:$0xff]   ;;  %v2903_v26 = vld [vmem:[#allocation7 + $0x20] ss:$8 sps:$4 sm:$0xff]  }
  0x8c   :  { %1397 = vmatprep.subr.bf16.mxu1 %v2740_v27  ;;  %v2908_v27 = vld [vmem:[#allocation7 + $0x34] ss:$8 sps:$4 sm:$0xff]  }
  0x8e   :  { %1312 = vmatpush1.bf16.msra.mxu0 %v2735_v28  ;;  %v2810_v28 = vld [vmem:[#allocation5 + $0xa0] ss:$24 sps:$4 sm:$0xff]  }
  0x8f   :  { %1398 = vmatpush1.bf16.msra.mxu1 %v2738_v29  ;;  %1313 = vmatprep.subr.bf16.mxu0 %v2743_v30  ;;  %v2815_v29 = vld [vmem:[#allocation5 + $0xd4] ss:$24 sps:$4 sm:$0xff]  }
  0x90   :  { %1399 = vmatprep.subr.bf16.mxu1 %v2746_v31  ;;  %v2911_v30 = vld [vmem:[#allocation7 + $0x44] ss:$8 sps:$4 sm:$0xff]   ;;  %v2813_v31 = vld [vmem:[#allocation5 + $0xd0] ss:$24 sps:$4 sm:$0xff]  }
  0x92   :  { %1314 = vmatpush1.bf16.msra.mxu0 %v2741_v33  ;;  %v2909_v33 = vld [vmem:[#allocation7 + $0x40] ss:$8 sps:$4 sm:$0xff]  }
  0x93   :  { %1400 = vmatpush1.bf16.msra.mxu1 %v2744_v34  ;;  %1315 = vmatprep.subr.bf16.mxu0 %v2749_v36  ;;  %v2816_v34 = vld [vmem:[#allocation5 + $0x100] ss:$24 sps:$4 sm:$0xff]   ;;  %v2821_v36 = vld [vmem:[#allocation5 + $0x134] ss:$24 sps:$4 sm:$0xff]  }
  0x94   :  { %1401 = vmatprep.subr.bf16.mxu1 %v2752_v38  ;;  %v2912_v38 = vld [vmem:[#allocation7 + $0x50] ss:$8 sps:$4 sm:$0xff]  }
  0x96   :  { %1316 = vmatpush1.bf16.msra.mxu0 %v2747_v39  ;;  %v2917_v39 = vld [vmem:[#allocation7 + $0x64] ss:$8 sps:$4 sm:$0xff]  }
  0x97   :  { %1402 = vmatpush1.bf16.msra.mxu1 %v2750_v40  ;;  %1317 = vmatprep.subr.bf16.mxu0 %v2755_v41  ;;  %v2819_v40 = vld [vmem:[#allocation5 + $0x130] ss:$24 sps:$4 sm:$0xff]   ;;  %v2824_v41 = vld [vmem:[#allocation5 + $0x164] ss:$24 sps:$4 sm:$0xff]  }
  0x98   :  { %1403 = vmatprep.subr.bf16.mxu1 %v2758_v42  ;;  %v2915_v42 = vld [vmem:[#allocation7 + $0x60] ss:$8 sps:$4 sm:$0xff]  }
  0x9a   :  { %1318 = vmatpush1.bf16.msra.mxu0 %v2753_v43  ;;  %v2920_v43 = vld [vmem:[#allocation7 + $0x74] ss:$8 sps:$4 sm:$0xff]  }
  0x9b   :  { %1404 = vmatpush1.bf16.msra.mxu1 %v2756_v44  ;;  %1319 = vmatprep.subr.bf16.mxu0 %v2761_v45  ;;  %v2822_v44 = vld [vmem:[#allocation5 + $0x160] ss:$24 sps:$4 sm:$0xff]   ;;  %v2827_v45 = vld [vmem:[#allocation5 + $0x194] ss:$24 sps:$4 sm:$0xff]  }
  0x9c   :  { %1405 = vmatprep.subr.bf16.mxu1 %v2764_v46  ;;  %v2918_v46 = vld [vmem:[#allocation7 + $0x70] ss:$8 sps:$4 sm:$0xff]  }
  0x9e   :  { %1320 = vmatpush1.bf16.msra.mxu0 %v2759_v47  ;;  %v2923_v47 = vld [vmem:[#allocation7 + $0x84] ss:$8 sps:$4 sm:$0xff]  }
  0x9f   :  { %1406 = vmatpush1.bf16.msra.mxu1 %v2762_v48  ;;  %1321 = vmatprep.subr.bf16.mxu0 %v2767_v49  ;;  %v2825_v48 = vld [vmem:[#allocation5 + $0x190] ss:$24 sps:$4 sm:$0xff]   ;;  %v2830_v49 = vld [vmem:[#allocation5 + $0x1c4] ss:$24 sps:$4 sm:$0xff]  }
  0xa0   :  { %1407 = vmatprep.subr.bf16.mxu1 %v2770_v51  ;;  %v2921_v51 = vld [vmem:[#allocation7 + $0x80] ss:$8 sps:$4 sm:$0xff]  }
  0xa2   :  { %1322 = vmatpush1.bf16.msra.mxu0 %v2765_v52  ;;  %v2926_v52 = vld [vmem:[#allocation7 + $0x94] ss:$8 sps:$4 sm:$0xff]  }
  0xa3   :  { %1408 = vmatpush1.bf16.msra.mxu1 %v2768_v53  ;;  %1323 = vmatprep.subr.bf16.mxu0 %v2773_v54  ;;  %v2828_v53 = vld [vmem:[#allocation5 + $0x1c0] ss:$24 sps:$4 sm:$0xff]   ;;  %v2833_v54 = vld [vmem:[#allocation5 + $0x1f4] ss:$24 sps:$4 sm:$0xff]  }
  0xa4   :  { %1409 = vmatprep.subr.bf16.mxu1 %v2776_v55  ;;  %v2924_v55 = vld [vmem:[#allocation7 + $0x90] ss:$8 sps:$4 sm:$0xff]  }
  0xa6   :  { %1324 = vmatpush1.bf16.msra.mxu0 %v2771_v56  ;;  %v2929_v56 = vld [vmem:[#allocation7 + $0xa4] ss:$8 sps:$4 sm:$0xff]  }
  0xa7   :  { %1410 = vmatpush1.bf16.msra.mxu1 %v2774_v57  ;;  %1325 = vmatprep.subr.bf16.mxu0 %v2779_v58  ;;  %v2831_v57 = vld [vmem:[#allocation5 + $0x1f0] ss:$24 sps:$4 sm:$0xff]   ;;  %v2836_v58 = vld [vmem:[#allocation5 + $0x224] ss:$24 sps:$4 sm:$0xff]  }
  0xa8   :  { %1411 = vmatprep.subr.bf16.mxu1 %v2782_v59  ;;  %v2927_v59 = vld [vmem:[#allocation7 + $0xa0] ss:$8 sps:$4 sm:$0xff]  }
  0xaa   :  { %1326 = vmatpush1.bf16.msra.mxu0 %v2777_v60  ;;  %v2932_v60 = vld [vmem:[#allocation7 + $0xb4] ss:$8 sps:$4 sm:$0xff]  }
  0xab   :  { %1412 = vmatpush1.bf16.msra.mxu1 %v2780_v61  ;;  %1327 = vmatprep.subr.bf16.mxu0 %v2785_v62  ;;  %v2834_v61 = vld [vmem:[#allocation5 + $0x220] ss:$24 sps:$4 sm:$0xff]   ;;  %v2839_v62 = vld [vmem:[#allocation5 + $0x254] ss:$24 sps:$4 sm:$0xff]  }
  0xac   :  { %1413 = vmatprep.subr.bf16.mxu1 %v2788_v63  ;;  %v2930_v63 = vld [vmem:[#allocation7 + $0xb0] ss:$8 sps:$4 sm:$0xff]  }
  0xae   :  { %1328 = vmatpush1.bf16.msra.mxu0 %v2783_v0  ;;  %v2935_v0 = vld [vmem:[#allocation7 + $0xc4] ss:$8 sps:$4 sm:$0xff]  }
  0xaf   :  { %1414 = vmatpush1.bf16.msra.mxu1 %v2786_v1  ;;  %1329 = vmatprep.subr.bf16.mxu0 %v2791_v2  ;;  %v2837_v1 = vld [vmem:[#allocation5 + $0x250] ss:$24 sps:$4 sm:$0xff]   ;;  %v2842_v2 = vld [vmem:[#allocation5 + $0x284] ss:$24 sps:$4 sm:$0xff]  }
  0xb0   :  { %1415 = vmatprep.subr.bf16.mxu1 %v2794_v3  ;;  %v2933_v3 = vld [vmem:[#allocation7 + $0xc0] ss:$8 sps:$4 sm:$0xff]  }
  0xb2   :  { %1330 = vmatpush1.bf16.msra.mxu0 %v2789_v4  ;;  %v2938_v4 = vld [vmem:[#allocation7 + $0xd4] ss:$8 sps:$4 sm:$0xff]  }
  0xb3   :  { %1416 = vmatpush1.bf16.msra.mxu1 %v2792_v5  ;;  %1331 = vmatprep.subr.bf16.mxu0 %v2797_v6  ;;  %v2840_v5 = vld [vmem:[#allocation5 + $0x280] ss:$24 sps:$4 sm:$0xff]   ;;  %v2845_v6 = vld [vmem:[#allocation5 + $0x2b4] ss:$24 sps:$4 sm:$0xff]  }
  0xb4   :  { %1417 = vmatprep.subr.bf16.mxu1 %v2800_v7  ;;  %v2936_v7 = vld [vmem:[#allocation7 + $0xd0] ss:$8 sps:$4 sm:$0xff]  }
  0xb6   :  { %1332 = vmatpush1.bf16.msra.mxu0 %v2795_v8  ;;  %v2843_v8 = vld [vmem:[#allocation5 + $0x2b0] ss:$24 sps:$4 sm:$0xff]  }
  0xb7   :  { %1418 = vmatpush1.bf16.msra.mxu1 %v2798_v10  ;;  %1430 = vmatprep.subr.bf16.mxu0 %v2803_v13  ;;  %v2848_v10 = vld [vmem:[#allocation5 + $0x2e4] ss:$24 sps:$4 sm:$0xff]   ;;  %v2849_v13 = vld [vmem:[#allocation5 + $0x310] ss:$24 sps:$4 sm:$0xff]  }
  0xb8   :  { %2122 = vmatprep.subr.bf16.mxu1 %v2899_v19  ;;  %v2860_v19 = vld [vmem:[#allocation5 + $0x3a4] ss:$24 sps:$4 sm:$0xff]  }
  0xb9   :  { %1334 = vmatmul.mubr.bf16.vlgmr.msra.gmra.mrb[0].mxu0 %v3225_v14 }
  0xba   :  { %1420 = vmatmul.mubr.bf16.vlgmr.msra.gmra.mrb[0].mxu1 %v3225_v14  ;;  %1431 = vmatpush1.bf16.msra.mxu0 %v2801_v15  ;;  %v2854_v15 = vld [vmem:[#allocation5 + $0x344] ss:$24 sps:$4 sm:$0xff]  }
  0xbb   :  { %1462 = vmatprep.mubr.bf16.mxu0 %v3213_v50  ;;  %1432 = vmatprep.subr.bf16.mxu0 %v2806_v16  ;;  %v2906_v50 = vld [vmem:[#allocation7 + $0x30] ss:$8 sps:$4 sm:$0xff]  }
  0xbc   :  { %2123 = vmatpush1.bf16.msra.mxu1 %v2897_v18  ;;  %v2852_v16 = vld [vmem:[#allocation5 + $0x340] ss:$24 sps:$4 sm:$0xff]   ;;  %v2855_v18 = vld [vmem:[#allocation5 + $0x370] ss:$24 sps:$4 sm:$0xff]  }
  0xbd   :  { %2124 = vmatprep.subr.bf16.mxu1 %v2902_v21  ;;  %v2863_v21 = vld [vmem:[#allocation5 + $0x3d4] ss:$24 sps:$4 sm:$0xff]  }
  0xbe   :  { %1433 = vmatpush1.bf16.msra.mxu0 %v2804_v17  ;;  %v2857_v17 = vld [vmem:[#allocation5 + $0x374] ss:$24 sps:$4 sm:$0xff]  }
  0xbf   :  { %1434 = vmatprep.subr.bf16.mxu0 %v2809_v20  ;;  %v2858_v20 = vld [vmem:[#allocation5 + $0x3a0] ss:$24 sps:$4 sm:$0xff]  }
  0xc0   :  { %2125 = vmatpush1.bf16.msra.mxu1 %v2900_v22  ;;  %v2861_v22 = vld [vmem:[#allocation5 + $0x3d0] ss:$24 sps:$4 sm:$0xff]  }
  0xc1   :  { %2126 = vmatprep.subr.bf16.mxu1 %v2905_v23  ;;  %v2866_v23 = vld [vmem:[#allocation5 + $0x404] ss:$24 sps:$4 sm:$0xff]  }
  0xc2   :  { %1435 = vmatpush1.bf16.msra.mxu0 %v2807_v24  ;;  %v2869_v24 = vld [vmem:[#allocation5 + $0x434] ss:$24 sps:$4 sm:$0xff]  }
  0xc3   :  { %1436 = vmatprep.subr.bf16.mxu0 %v2812_v25  ;;  %v2941_v25 = vld [vmem:[#allocation7 + $0xe4] ss:$8 sps:$4 sm:$0xff]  }
  0xc4   :  { %2127 = vmatpush1.bf16.msra.mxu1 %v2903_v26  ;;  %v2867_v26 = vld [vmem:[#allocation5 + $0x430] ss:$24 sps:$4 sm:$0xff]  }
  0xc5   :  { %2128 = vmatprep.subr.bf16.mxu1 %v2908_v27  ;;  %v2872_v27 = vld [vmem:[#allocation5 + $0x464] ss:$24 sps:$4 sm:$0xff]  }
  0xc6   :  { %1437 = vmatpush1.bf16.msra.mxu0 %v2810_v28  ;;  %v2944_v28 = vld [vmem:[#allocation7 + $0xf4] ss:$8 sps:$4 sm:$0xff]  }
  0xc7   :  { %1438 = vmatprep.subr.bf16.mxu0 %v2815_v29  ;;  %v2942_v29 = vld [vmem:[#allocation7 + $0xf0] ss:$8 sps:$4 sm:$0xff]  }
  0xc8   :  { %2129 = vmatpush1.bf16.msra.mxu1 %v2906_v50  ;;  %v2870_v50 = vld [vmem:[#allocation5 + $0x460] ss:$24 sps:$4 sm:$0xff]  }
  0xc9   :  { %2130 = vmatprep.subr.bf16.mxu1 %v2911_v30  ;;  %v2875_v30 = vld [vmem:[#allocation5 + $0x494] ss:$24 sps:$4 sm:$0xff]  }
  0xca   :  { %1439 = vmatpush1.bf16.msra.mxu0 %v2813_v31  ;;  %v2947_v31 = vld [vmem:[#allocation7 + $0x104] ss:$8 sps:$4 sm:$0xff]  }
  0xcb   :  { %1440 = vmatprep.subr.bf16.mxu0 %v2818_v32  ;;  %v2873_v32 = vld [vmem:[#allocation5 + $0x490] ss:$24 sps:$4 sm:$0xff]  }
  0xcc   :  { %2131 = vmatpush1.bf16.msra.mxu1 %v2909_v33  ;;  %v2878_v33 = vld [vmem:[#allocation5 + $0x4c4] ss:$24 sps:$4 sm:$0xff]  }
  0xcd   :  { %2132 = vmatprep.subr.bf16.mxu1 %v2914_v35  ;;  %v2881_v35 = vld [vmem:[#allocation5 + $0x4f4] ss:$24 sps:$4 sm:$0xff]  }
  0xce   :  { %1441 = vmatpush1.bf16.msra.mxu0 %v2816_v34  ;;  %v2876_v34 = vld [vmem:[#allocation5 + $0x4c0] ss:$24 sps:$4 sm:$0xff]  }
  0xcf   :  { %1442 = vmatprep.subr.bf16.mxu0 %v2821_v36  ;;  %v2879_v36 = vld [vmem:[#allocation5 + $0x4f0] ss:$24 sps:$4 sm:$0xff]  }
  0xd0   :  { %2133 = vmatpush1.bf16.msra.mxu1 %v2912_v38  ;;  %v2884_v38 = vld [vmem:[#allocation5 + $0x524] ss:$24 sps:$4 sm:$0xff]  }
  0xd1   :  { %2134 = vmatprep.subr.bf16.mxu1 %v2917_v39  ;;  %v2882_v39 = vld [vmem:[#allocation5 + $0x520] ss:$24 sps:$4 sm:$0xff]  }
  0xd2   :  { %1443 = vmatpush1.bf16.msra.mxu0 %v2819_v40  ;;  %v2887_v40 = vld [vmem:[#allocation5 + $0x554] ss:$24 sps:$4 sm:$0xff]  }
  0xd3   :  { %1444 = vmatprep.subr.bf16.mxu0 %v2824_v41  ;;  %v2885_v41 = vld [vmem:[#allocation5 + $0x550] ss:$24 sps:$4 sm:$0xff]  }
  0xd4   :  { %2135 = vmatpush1.bf16.msra.mxu1 %v2915_v42  ;;  %v2890_v42 = vld [vmem:[#allocation5 + $0x584] ss:$24 sps:$4 sm:$0xff]  }
  0xd5   :  { %2136 = vmatprep.subr.bf16.mxu1 %v2920_v43  ;;  %v2888_v43 = vld [vmem:[#allocation5 + $0x580] ss:$24 sps:$4 sm:$0xff]  }
  0xd6   :  { %1445 = vmatpush1.bf16.msra.mxu0 %v2822_v44  ;;  %v2893_v44 = vld [vmem:[#allocation5 + $0x5b4] ss:$24 sps:$4 sm:$0xff]  }
  0xd7   :  { %1446 = vmatprep.subr.bf16.mxu0 %v2827_v45  ;;  %v2891_v45 = vld [vmem:[#allocation5 + $0x5b0] ss:$24 sps:$4 sm:$0xff]  }
  0xd8   :  { %2137 = vmatpush1.bf16.msra.mxu1 %v2918_v46  ;;  %v2896_v46 = vld [vmem:[#allocation5 + $0x5e4] ss:$24 sps:$4 sm:$0xff]  }
  0xd9   :  { %2138 = vmatprep.subr.bf16.mxu1 %v2923_v47  ;;  %v2894_v47 = vld [vmem:[#allocation5 + $0x5e0] ss:$24 sps:$4 sm:$0xff]  }
  0xda   :  { %1447 = vmatpush1.bf16.msra.mxu0 %v2825_v48  ;;  %v268_v48 = vlaneseq }
  0xdb   :  { %1448 = vmatprep.subr.bf16.mxu0 %v2830_v49 }
  0xdc   :  { %2139 = vmatpush1.bf16.msra.mxu1 %v2921_v51  ;;  %v3233_v49 = vshrl.u32 %v268_v48, 7  ;;  %v2986_v48 = vld [vmem:[#allocation7 + $0x1d4] ss:$8 sps:$4 sm:$0xff]  }
  0xdd   :  { %2140 = vmatprep.subr.bf16.mxu1 %v2926_v52 }
  0xde   :  { %1449 = vmatpush1.bf16.msra.mxu0 %v2828_v53  ;;  %v270_v51 = vsub.s32 0, %v3233_v49  ;;  %v278_v52 = vsub.s32 2, %v3233_v49  ;;  %v3240_v53 = vld [vmem:[%s3280_s2] sm:$0x3f] }
  0xdf   :  { %1450 = vmatprep.subr.bf16.mxu0 %v2833_v54  ;;  %v274_v54 = vsub.s32 1, %v3233_v49 }
  0xe0   :  { %2141 = vmatpush1.bf16.msra.mxu1 %v2924_v55  ;;  %v282_v55 = vsub.s32 3, %v3233_v49 }
  0xe1   :  { %2142 = vmatprep.subr.bf16.mxu1 %v2929_v56  ;;  %v279_v56 = vrot.slane %v3240_v53, %v278_v52  ;;  %v2984_v52 = vld [vmem:[#allocation7 + $0x1d0] ss:$8 sps:$4 sm:$0xff]  }
  0xe2   :  { %1451 = vmatpush1.bf16.msra.mxu0 %v2831_v57  ;;  %v275_v57 = vrot.slane %v3240_v53, %v274_v54 }
  0xe3   :  { %1452 = vmatprep.subr.bf16.mxu0 %v2836_v58  ;;  %v283_v58 = vrot.slane %v3240_v53, %v282_v55  ;;  %v2989_v55 = vld [vmem:[#allocation7 + $0x1e4] ss:$8 sps:$4 sm:$0xff]  }
  0xe4   :  { %2143 = vmatpush1.bf16.msra.mxu1 %v2927_v59 }
  0xe5   :  { %2144 = vmatprep.subr.bf16.mxu1 %v2932_v60 }
  0xe6   :  { %1453 = vmatpush1.bf16.msra.mxu0 %v2834_v61 }
  0xe7   :  { %1454 = vmatprep.subr.bf16.mxu0 %v2839_v62 }
  0xe8   :  { %2145 = vmatpush1.bf16.msra.mxu1 %v2930_v63 }
  0xe9   :  { %2146 = vmatprep.subr.bf16.mxu1 %v2935_v0 }
  0xea   :  { %1455 = vmatpush1.bf16.msra.mxu0 %v2837_v1 }
  0xeb   :  { %1456 = vmatprep.subr.bf16.mxu0 %v2842_v2 }
  0xec   :  { %2147 = vmatpush1.bf16.msra.mxu1 %v2933_v3 }
  0xed   :  { %2148 = vmatprep.subr.bf16.mxu1 %v2938_v4 }
  0xee   :  { %1457 = vmatpush1.bf16.msra.mxu0 %v2840_v5 }
  0xef   :  { %1458 = vmatprep.subr.bf16.mxu0 %v2845_v6 }
  0xf0   :  { %2149 = vmatpush1.bf16.msra.mxu1 %v2936_v7 }
  0xf1   :  { %2150 = vmatprep.subr.bf16.mxu1 %v2941_v25  ;;  %v2950_v25 = vld [vmem:[#allocation7 + $0x114] ss:$8 sps:$4 sm:$0xff]  }
  0xf2   :  { %1459 = vmatpush1.bf16.msra.mxu0 %v2843_v8 }
  0xf3   :  { %1460 = vmatprep.subr.bf16.mxu0 %v2848_v10 }
  0xf6   :  { %1461 = vmatpush1.bf16.msra.mxu0 %v2846_v11 }
  0xf7   :  { %1473 = vmatprep.subr.bf16.mxu0 %v2851_v12 }
  0xf9   :  { %1463 = vmatmul.mubr.bf16.vlgmr.msra.gmra.mrb[4].mxu0 %v3217_v9  ;;  %v2864_v9 = vld [vmem:[#allocation5 + $0x400] ss:$24 sps:$4 sm:$0xff]  }
  0xfa   :  { %1474 = vmatpush1.bf16.msra.mxu0 %v2849_v13  ;;  %1505 = vmatprep.mubr.bf16.mxu0 %v3221_v37  ;;  %v2939_v37 = vld [vmem:[#allocation7 + $0xe0] ss:$8 sps:$4 sm:$0xff]  }
  0xfb   :  { %1475 = vmatprep.subr.bf16.mxu0 %v2854_v15  ;;  %2151 = vmatpush1.bf16.msra.mxu1 %v2939_v37  ;;  %v2948_v37 = vld [vmem:[#allocation7 + $0x110] ss:$8 sps:$4 sm:$0xff]  }
  0xfc   :  { %2152 = vmatprep.subr.bf16.mxu1 %v2944_v28  ;;  %v2956_v28 = vld [vmem:[#allocation7 + $0x134] ss:$8 sps:$4 sm:$0xff]  }
  0xfe   :  { %1476 = vmatpush1.bf16.msra.mxu0 %v2852_v16 }
  0xff   :  { %1477 = vmatprep.subr.bf16.mxu0 %v2857_v17  ;;  %2153 = vmatpush1.bf16.msra.mxu1 %v2942_v29  ;;  %v2954_v29 = vld [vmem:[#allocation7 + $0x130] ss:$8 sps:$4 sm:$0xff]  }
 0x100   :  { %2165 = vmatprep.subr.bf16.mxu1 %v2947_v31  ;;  %v2962_v31 = vld [vmem:[#allocation7 + $0x154] ss:$8 sps:$4 sm:$0xff]  }
 0x102   :  { %1478 = vmatpush1.bf16.msra.mxu0 %v2855_v18 }
 0x103   :  { %1479 = vmatprep.subr.bf16.mxu0 %v2860_v19 }
 0x106   :  { %1480 = vmatpush1.bf16.msra.mxu0 %v2858_v20 }
 0x107   :  { %1481 = vmatprep.subr.bf16.mxu0 %v2863_v21 }
 0x10a   :  { %1482 = vmatpush1.bf16.msra.mxu0 %v2861_v22 }
 0x10b   :  { %1483 = vmatprep.subr.bf16.mxu0 %v2866_v23 }
 0x10e   :  { %1484 = vmatpush1.bf16.msra.mxu0 %v2864_v9 }
 0x10f   :  { %1485 = vmatprep.subr.bf16.mxu0 %v2869_v24  ;;  %v2945_v24 = vld [vmem:[#allocation7 + $0x100] ss:$8 sps:$4 sm:$0xff]  }
 0x112   :  { %1486 = vmatpush1.bf16.msra.mxu0 %v2867_v26  ;;  %v2953_v26 = vld [vmem:[#allocation7 + $0x124] ss:$8 sps:$4 sm:$0xff]  }
 0x113   :  { %1487 = vmatprep.subr.bf16.mxu0 %v2872_v27  ;;  %v2951_v27 = vld [vmem:[#allocation7 + $0x120] ss:$8 sps:$4 sm:$0xff]  }
 0x116   :  { %1488 = vmatpush1.bf16.msra.mxu0 %v2870_v50  ;;  %v2959_v50 = vld [vmem:[#allocation7 + $0x144] ss:$8 sps:$4 sm:$0xff]  }
 0x117   :  { %1489 = vmatprep.subr.bf16.mxu0 %v2875_v30  ;;  %v2957_v30 = vld [vmem:[#allocation7 + $0x140] ss:$8 sps:$4 sm:$0xff]  }
 0x11a   :  { %1490 = vmatpush1.bf16.msra.mxu0 %v2873_v32  ;;  %v2960_v32 = vld [vmem:[#allocation7 + $0x150] ss:$8 sps:$4 sm:$0xff]  }
 0x11b   :  { %1491 = vmatprep.subr.bf16.mxu0 %v2878_v33  ;;  %v2965_v33 = vld [vmem:[#allocation7 + $0x164] ss:$8 sps:$4 sm:$0xff]  }
 0x11e   :  { %1492 = vmatpush1.bf16.msra.mxu0 %v2876_v34  ;;  %v2963_v34 = vld [vmem:[#allocation7 + $0x160] ss:$8 sps:$4 sm:$0xff]  }
 0x11f   :  { %1493 = vmatprep.subr.bf16.mxu0 %v2881_v35  ;;  %v2968_v35 = vld [vmem:[#allocation7 + $0x174] ss:$8 sps:$4 sm:$0xff]  }
 0x122   :  { %1494 = vmatpush1.bf16.msra.mxu0 %v2879_v36  ;;  %v2966_v36 = vld [vmem:[#allocation7 + $0x170] ss:$8 sps:$4 sm:$0xff]  }
 0x123   :  { %1495 = vmatprep.subr.bf16.mxu0 %v2884_v38  ;;  %v2971_v38 = vld [vmem:[#allocation7 + $0x184] ss:$8 sps:$4 sm:$0xff]  }
 0x126   :  { %1496 = vmatpush1.bf16.msra.mxu0 %v2882_v39  ;;  %v2969_v39 = vld [vmem:[#allocation7 + $0x180] ss:$8 sps:$4 sm:$0xff]  }
 0x127   :  { %1497 = vmatprep.subr.bf16.mxu0 %v2887_v40  ;;  %v2974_v40 = vld [vmem:[#allocation7 + $0x194] ss:$8 sps:$4 sm:$0xff]  }
 0x12a   :  { %1498 = vmatpush1.bf16.msra.mxu0 %v2885_v41  ;;  %v2972_v41 = vld [vmem:[#allocation7 + $0x190] ss:$8 sps:$4 sm:$0xff]  }
 0x12b   :  { %1499 = vmatprep.subr.bf16.mxu0 %v2890_v42  ;;  %v2977_v42 = vld [vmem:[#allocation7 + $0x1a4] ss:$8 sps:$4 sm:$0xff]  }
 0x12e   :  { %1500 = vmatpush1.bf16.msra.mxu0 %v2888_v43  ;;  %v2975_v43 = vld [vmem:[#allocation7 + $0x1a0] ss:$8 sps:$4 sm:$0xff]  }
 0x12f   :  { %1501 = vmatprep.subr.bf16.mxu0 %v2893_v44  ;;  %v2980_v44 = vld [vmem:[#allocation7 + $0x1b4] ss:$8 sps:$4 sm:$0xff]  }
 0x132   :  { %1502 = vmatpush1.bf16.msra.mxu0 %v2891_v45  ;;  %v2978_v45 = vld [vmem:[#allocation7 + $0x1b0] ss:$8 sps:$4 sm:$0xff]  }
 0x133   :  { %1503 = vmatprep.subr.bf16.mxu0 %v2896_v46  ;;  %v2983_v46 = vld [vmem:[#allocation7 + $0x1c4] ss:$8 sps:$4 sm:$0xff]  }
 0x136   :  { %1504 = vmatpush1.bf16.msra.mxu0 %v2894_v47  ;;  %v2981_v47 = vld [vmem:[#allocation7 + $0x1c0] ss:$8 sps:$4 sm:$0xff]  }
 0x139   :  { %1506 = vmatmul.mubr.bf16.vlgmr.msra.gmra.mrb[4].mxu0 %v3225_v14  ;;  %v271_v14 = vrot.slane %v3240_v53, %v270_v51 }
 0x18c   :  { %v1335_v59 = vpop.f32.mrb[0].mxu0 }
 0x18d   :  { %v1421_v60 = vpop.f32.mrb[0].mxu1  ;;  %v2561_v61 = vadd.f32 %v1335_v59, %v271_v14  ;;  %v1337_v63 = vpop.f32.mrb[1].mxu0  ;;  %v2993_v59 = vld [vmem:[#allocation7 + $0x200] ss:$8 sps:$4 sm:$0xff]  }
 0x18e   :  { %v2565_v62 = vadd.f32 %v1421_v60, %v279_v56  ;;  %v1423_v0 = vpop.f32.mrb[1].mxu1  ;;  %v2562_v1 = vadd.f32 %v1337_v63, %v275_v57  ;;  %v1339_v3 = vpop.f32.mrb[2].mxu0  ;;  %v2998_v60 = vld [vmem:[#allocation7 + $0x214] ss:$8 sps:$4 sm:$0xff]   ;;  %v2999_v63 = vld [vmem:[#allocation7 + $0x220] ss:$8 sps:$4 sm:$0xff]  }
 0x18f   :  { %v2566_v2 = vadd.f32 %v1423_v0, %v283_v58  ;;  %v1425_v4 = vpop.f32.mrb[2].mxu1  ;;  %v2563_v6 = vadd.f32 %v1339_v3, %v271_v14  ;;  %v1341_v8 = vpop.f32.mrb[3].mxu0  ;;  %v1516_v15 = vmax.f32 %v2561_v61, 0.0  ;;  %v2987_v14 = vld [vmem:[#allocation7 + $0x1e0] ss:$8 sps:$4 sm:$0xff]  }
 0x190   :  { %v1518_v5 = vmax.f32 %v2565_v62, 0.0  ;;  %v2567_v7 = vadd.f32 %v1425_v4, %v279_v56  ;;  %v1427_v10 = vpop.f32.mrb[3].mxu1  ;;  %v2564_v12 = vadd.f32 %v1341_v8, %v275_v57  ;;  %v1517_v18 = vmax.f32 %v2562_v1, 0.0  ;;  %v2992_v56 = vld [vmem:[#allocation7 + $0x1f4] ss:$8 sps:$4 sm:$0xff]  }
 0x191   :  { %v1519_v11 = vmax.f32 %v2566_v2, 0.0  ;;  %v2568_v13 = vadd.f32 %v1427_v10, %v283_v58  ;;  %v1522_v16 = vmax.f32 %v2563_v6, 0.0  ;;  %v2990_v57 = vld [vmem:[#allocation7 + $0x1f0] ss:$8 sps:$4 sm:$0xff]   ;;  %v2995_v58 = vld [vmem:[#allocation7 + $0x204] ss:$8 sps:$4 sm:$0xff]  }
 0x192   :  { %v1524_v17 = vmax.f32 %v2567_v7, 0.0  ;;  %v1523_v19 = vmax.f32 %v2564_v12, 0.0  ;;  %v2996_v61 = vld [vmem:[#allocation7 + $0x210] ss:$8 sps:$4 sm:$0xff]   ;;  %v3001_v62 = vld [vmem:[#allocation7 + $0x224] ss:$8 sps:$4 sm:$0xff]  }
 0x193   :  { %v1525_v20 = vmax.f32 %v2568_v13, 0.0  ;;  %v1528_v21 = vpack.c.bf16 %v1522_v16, %v1516_v15  ;;  %v3004_v0 = vld [vmem:[#allocation7 + $0x234] ss:$8 sps:$4 sm:$0xff]   ;;  %v3002_v1 = vld [vmem:[#allocation7 + $0x230] ss:$8 sps:$4 sm:$0xff]  }
 0x194   :  { %v3252_v22 = vpack.c.bf16 %v1524_v17, %v1518_v5  ;;  %v1529_v23 = vpack.c.bf16 %v1523_v19, %v1517_v18  ;;  %v3007_v2 = vld [vmem:[#allocation7 + $0x244] ss:$8 sps:$4 sm:$0xff]   ;;  %v3005_v3 = vld [vmem:[#allocation7 + $0x240] ss:$8 sps:$4 sm:$0xff]   ;;  %v3010_v4 = vld [vmem:[#allocation7 + $0x254] ss:$8 sps:$4 sm:$0xff]  }
 0x195   :  { %v1531_v9 = vpack.c.bf16 %v1525_v20, %v1519_v11  ;;  %v3008_v5 = vld [vmem:[#allocation7 + $0x250] ss:$8 sps:$4 sm:$0xff]   ;;  %v3013_v6 = vld [vmem:[#allocation7 + $0x264] ss:$8 sps:$4 sm:$0xff]   ;;  %v3011_v7 = vld [vmem:[#allocation7 + $0x260] ss:$8 sps:$4 sm:$0xff]  }
 0x196   :  { %2154 = vmatprep.mubr.bf16.mxu1 %v1529_v23  ;;  %v3016_v8 = vld [vmem:[#allocation7 + $0x274] ss:$8 sps:$4 sm:$0xff]   ;;  %v3014_v10 = vld [vmem:[#allocation7 + $0x270] ss:$8 sps:$4 sm:$0xff]   ;;  %v3019_v11 = vld [vmem:[#allocation7 + $0x284] ss:$8 sps:$4 sm:$0xff]  }
 0x197   :  { %2155 = vmatmul.mubr.bf16.vlgmr.msra.gmra.mrb[4].mxu1 %v1528_v21  ;;  %v3017_v12 = vld [vmem:[#allocation7 + $0x280] ss:$8 sps:$4 sm:$0xff]   ;;  %v3022_v13 = vld [vmem:[#allocation7 + $0x294] ss:$8 sps:$4 sm:$0xff]   ;;  %v3020_v15 = vld [vmem:[#allocation7 + $0x290] ss:$8 sps:$4 sm:$0xff]  }
 0x198   :  { %2166 = vmatpush1.bf16.msra.mxu1 %v2945_v24  ;;  %2197 = vmatprep.mubr.bf16.mxu1 %v1531_v9  ;;  %v3025_v16 = vld [vmem:[#allocation7 + $0x2a4] ss:$8 sps:$4 sm:$0xff]   ;;  %v3023_v17 = vld [vmem:[#allocation7 + $0x2a0] ss:$8 sps:$4 sm:$0xff]   ;;  %v3028_v18 = vld [vmem:[#allocation7 + $0x2b4] ss:$8 sps:$4 sm:$0xff]  }
 0x199   :  { %2167 = vmatprep.subr.bf16.mxu1 %v2950_v25  ;;  %v3026_v19 = vld [vmem:[#allocation7 + $0x2b0] ss:$8 sps:$4 sm:$0xff]   ;;  %v3031_v20 = vld [vmem:[#allocation7 + $0x2c4] ss:$8 sps:$4 sm:$0xff]   ;;  %v3029_v21 = vld [vmem:[#allocation7 + $0x2c0] ss:$8 sps:$4 sm:$0xff]  }
 0x19a   :  { %v286_v23 = vsub.s32 4, %v3233_v49  ;;  %v290_v9 = vsub.s32 5, %v3233_v49  ;;  %v3032_v24 = vld [vmem:[#allocation7 + $0x2d0] ss:$8 sps:$4 sm:$0xff]  }
 0x19c   :  { %2168 = vmatpush1.bf16.msra.mxu1 %v2948_v37  ;;  %v287_v25 = vrot.slane %v3240_v53, %v286_v23  ;;  %v3037_v37 = vld [vmem:[#allocation7 + $0x2e4] ss:$8 sps:$4 sm:$0xff]  }
 0x19d   :  { %2169 = vmatprep.subr.bf16.mxu1 %v2953_v26  ;;  %v291_v26 = vrot.slane %v3240_v53, %v290_v9 }
 0x1a0   :  { %2170 = vmatpush1.bf16.msra.mxu1 %v2951_v27 }
 0x1a1   :  { %2171 = vmatprep.subr.bf16.mxu1 %v2956_v28  ;;  %v3035_v28 = vld [vmem:[#allocation7 + $0x2e0] ss:$8 sps:$4 sm:$0xff]  }
 0x1a4   :  { %2172 = vmatpush1.bf16.msra.mxu1 %v2954_v29 }
 0x1a5   :  { %2173 = vmatprep.subr.bf16.mxu1 %v2959_v50 }
 0x1a8   :  { %2174 = vmatpush1.bf16.msra.mxu1 %v2957_v30  ;;  %v3040_v30 = vld [vmem:[#allocation7 + $0x2f4] ss:$8 sps:$4 sm:$0xff]  }
 0x1a9   :  { %2175 = vmatprep.subr.bf16.mxu1 %v2962_v31 }
 0x1ac   :  { %2176 = vmatpush1.bf16.msra.mxu1 %v2960_v32 }
 0x1ad   :  { %2177 = vmatprep.subr.bf16.mxu1 %v2965_v33 }
 0x1b0   :  { %2178 = vmatpush1.bf16.msra.mxu1 %v2963_v34 }
 0x1b1   :  { %2179 = vmatprep.subr.bf16.mxu1 %v2968_v35 }
 0x1b4   :  { %2180 = vmatpush1.bf16.msra.mxu1 %v2966_v36  ;;  %v3038_v36 = vld [vmem:[#allocation7 + $0x2f0] ss:$8 sps:$4 sm:$0xff]  }
 0x1b5   :  { %2181 = vmatprep.subr.bf16.mxu1 %v2971_v38 }
 0x1b8   :  { %2182 = vmatpush1.bf16.msra.mxu1 %v2969_v39 }
 0x1b9   :  { %2183 = vmatprep.subr.bf16.mxu1 %v2974_v40 }
 0x1bc   :  { %2184 = vmatpush1.bf16.msra.mxu1 %v2972_v41 }
 0x1bd   :  { %2185 = vmatprep.subr.bf16.mxu1 %v2977_v42 }
 0x1c0   :  { %2186 = vmatpush1.bf16.msra.mxu1 %v2975_v43  ;;  %v1630_v43 = vld [vmem:[%s3282_s4] sm:$0x3]  ;;  %s3107_s4 = scalar_lea.vmem %s2261_s11, 512 }
 0x1c1   :  { %2187 = vmatprep.subr.bf16.mxu1 %v2980_v44  ;;  %v1635_v44 = vrot.slane %v1630_v43, %v270_v51  ;;  %p3108_p10 = scmp.ne.s32.totalorder %s2261_s11, %s3107_s4  ;;  %p3113_p12 = scmp.lt.s32.totalorder %s3107_s4, %s3107_s4 }
 0x1c3   :  { %p3114_p13 = por %p3113_p12, %p3112_p11 }
 0x1c4   :  { %2188 = vmatpush1.bf16.msra.mxu1 %v2978_v45  ;;  %v1639_v45 = vrot.slane %v1630_v43, %v274_v54 }
 0x1c5   :  { %2189 = vmatprep.subr.bf16.mxu1 %v2983_v46  ;;  %p3115_p0 = pnand %p3114_p13, %p3108_p10 }
 0x1c8   :  { %2190 = vmatpush1.bf16.msra.mxu1 %v2981_v47 }
 0x1c9   :  { %2191 = vmatprep.subr.bf16.mxu1 %v2986_v48 }
 0x1cc   :  { %2192 = vmatpush1.bf16.msra.mxu1 %v2984_v52 }
 0x1cd   :  { %2193 = vmatprep.subr.bf16.mxu1 %v2989_v55 }
 0x1d0   :  { %2194 = vmatpush1.bf16.msra.mxu1 %v2987_v14 }
 0x1d1   :  { %2195 = vmatprep.subr.bf16.mxu1 %v2992_v56 }
 0x1d4   :  { %2196 = vmatpush1.bf16.msra.mxu1 %v2990_v57 }
 0x1d5   :  { %2208 = vmatprep.subr.bf16.mxu1 %v2995_v58 }
 0x1d7   :  { %2198 = vmatmul.mubr.bf16.vlgmr.msra.gmra.mrb[4].mxu1 %v3252_v22  ;;  %v3034_v22 = vld [vmem:[#allocation7 + $0x2d4] ss:$8 sps:$4 sm:$0xff]  }
 0x1d8   :  { %2209 = vmatpush1.bf16.msra.mxu1 %v2993_v59 }
 0x1d9   :  { %2210 = vmatprep.subr.bf16.mxu1 %v2998_v60 }
 0x1dc   :  { %2211 = vmatpush1.bf16.msra.mxu1 %v2996_v61 }
 0x1dd   :  { %2212 = vmatprep.subr.bf16.mxu1 %v3001_v62 }
 0x1e0   :  { %2213 = vmatpush1.bf16.msra.mxu1 %v2999_v63 }
 0x1e1   :  { %2214 = vmatprep.subr.bf16.mxu1 %v3004_v0 }
 0x1e4   :  { %2215 = vmatpush1.bf16.msra.mxu1 %v3002_v1 }
 0x1e5   :  { %2216 = vmatprep.subr.bf16.mxu1 %v3007_v2 }
 0x1e8   :  { %2217 = vmatpush1.bf16.msra.mxu1 %v3005_v3 }
 0x1e9   :  { %2218 = vmatprep.subr.bf16.mxu1 %v3010_v4 }
 0x1ec   :  { %2219 = vmatpush1.bf16.msra.mxu1 %v3008_v5 }
 0x1ed   :  { %2220 = vmatprep.subr.bf16.mxu1 %v3013_v6 }
 0x1f0   :  { %2221 = vmatpush1.bf16.msra.mxu1 %v3011_v7 }
 0x1f1   :  { %2222 = vmatprep.subr.bf16.mxu1 %v3016_v8 }
 0x1f4   :  { %2223 = vmatpush1.bf16.msra.mxu1 %v3014_v10 }
 0x1f5   :  { %2224 = vmatprep.subr.bf16.mxu1 %v3019_v11 }
 0x1f8   :  { %2225 = vmatpush1.bf16.msra.mxu1 %v3017_v12 }
 0x1f9   :  { %2226 = vmatprep.subr.bf16.mxu1 %v3022_v13 }
 0x1fc   :  { %2227 = vmatpush1.bf16.msra.mxu1 %v3020_v15 }
 0x1fd   :  { %2228 = vmatprep.subr.bf16.mxu1 %v3025_v16 }
 0x200   :  { %2229 = vmatpush1.bf16.msra.mxu1 %v3023_v17 }
 0x201   :  { %2230 = vmatprep.subr.bf16.mxu1 %v3028_v18 }
 0x204   :  { %2231 = vmatpush1.bf16.msra.mxu1 %v3026_v19 }
 0x205   :  { %2232 = vmatprep.subr.bf16.mxu1 %v3031_v20 }
 0x208   :  { %2233 = vmatpush1.bf16.msra.mxu1 %v3029_v21 }
 0x209   :  { %2234 = vmatprep.subr.bf16.mxu1 %v3034_v22 }
 0x20c   :  { %v1507_v27 = vpop.f32.mrb[4].mxu0  ;;  %2235 = vmatpush1.bf16.msra.mxu1 %v3032_v24 }
 0x20d   :  { %v2569_v29 = vadd.f32 %v1507_v27, %v287_v25  ;;  %v1509_v50 = vpop.f32.mrb[5].mxu0  ;;  %2236 = vmatprep.subr.bf16.mxu1 %v3037_v37 }
 0x20e   :  { %v2570_v31 = vadd.f32 %v1509_v50, %v291_v26  ;;  %v1511_v32 = vpop.f32.mrb[6].mxu0 }
 0x20f   :  { %v2571_v33 = vadd.f32 %v1511_v32, %v287_v25  ;;  %v1513_v34 = vpop.f32.mrb[7].mxu0  ;;  %v1520_v38 = vmax.f32 %v2569_v29, 0.0 }
 0x210   :  { %v2572_v35 = vadd.f32 %v1513_v34, %v291_v26  ;;  %2237 = vmatpush1.bf16.msra.mxu1 %v3035_v28  ;;  %v1521_v40 = vmax.f32 %v2570_v31, 0.0 }
 0x211   :  { %v1526_v39 = vmax.f32 %v2571_v33, 0.0  ;;  %2238 = vmatprep.subr.bf16.mxu1 %v3040_v30 }
 0x212   :  { %v1527_v41 = vmax.f32 %v2572_v35, 0.0 }
 0x213   :  { %v1532_v53 = vpack.c.bf16 %v1526_v39, %v1520_v38 }
 0x214   :  { %v1533_v42 = vpack.c.bf16 %v1527_v41, %v1521_v40  ;;  %2239 = vmatpush1.bf16.msra.mxu1 %v3038_v36 }
 0x216   :  { %2240 = vmatprep.mubr.bf16.mxu1 %v1533_v42 }
 0x217   :  { %2241 = vmatmul.mubr.bf16.vlgmr.msra.gmra.mrb[4].mxu1 %v1532_v53 }
 0x2ea   :  { %v2242_v46 = vpop.f32.mrb[4].mxu1 }
 0x2eb   :  { %v2573_v47 = vadd.f32 %v2242_v46, %v1635_v44  ;;  %v2244_v48 = vpop.f32.mrb[5].mxu1 }
 0x2ec   :  { %v2574_v52 = vadd.f32 %v2244_v48, %v1639_v45  ;;  %v2246_v55 = vpop.f32.mrb[6].mxu1 }
 0x2ed   :  { %2251 = vst [vmem:[#allocation8] sm:$0xff] %v2573_v47  ;;  %v2575_v14 = vadd.f32 %v2246_v55, %v1635_v44  ;;  %v2248_v56 = vpop.f32.mrb[7].mxu1 }
 0x2ee   :  { %2252 = vst [vmem:[#allocation8 + $0x8] sm:$0xff] %v2574_v52  ;;  %v2576_v57 = vadd.f32 %v2248_v56, %v1639_v45 }
 0x2ef   :  { %2253 = vst [vmem:[#allocation8 + $0x10] sm:$0xff] %v2575_v14 }
 0x2f0   :  { %2254 = vst [vmem:[#allocation8 + $0x18] sm:$0xff] %v2576_v57 }
 0x2f1   :  { %3118 = shalt.err (!%p3115_p0)
}
 0x2f2   :  { %s3119_s14 = scalar_lea.hbm %s3283_s5, 512 }
 0x2f3   :  { %p3120_p1 = scmp.ne.s32.totalorder %s3283_s5, %s3119_s14  ;;  %p3123_p2 = scmp.lt.u32.totalorder %s3119_s14, %s3283_s5 }
 0x2f5   :  { %p3125_p3 = pnand %p3123_p2, %p3120_p1 }
 0x2f7   :  { %3128 = shalt.err (!%p3125_p3)
}
 0x2f8   :  { %s3145_s18 = smov 256   ;;  %s3146_s19 = smov 16  }
 0x2f9   :  { %2266 = dma.vmem_to_hbm [thread:$0]  %s2261_s11, 512, %s3283_s5, [#allocation4], %s3145_s18, %s3145_s18, %s3146_s19  }
 0x2fa   :  { %3133 = dma.done.wait [#allocation4], 512  }
 0x2fb   :  { %3134 = vsyncadd [#allocation4], 4294966784 }
 0x2fc   :  { %2270 = vsyncpa [#allocation3], 1 }
 0x2fd   :  { %2271 = vsyncpa [#allocation6], 1 }
 0x2fe   :  { %2272 = vsyncpa [#allocation4], 1 }

</bundles_post_ra>
